<compile_context>
chip_gen: v5e
topology: v5e:2x2
jax: 0.10.0
libtpu: 0.0.40
codegen_flags: <defaults>
</compile_context>

<pallas_src>
import jax
import jax.numpy as jnp
from jax.experimental import pallas as pl
from jax.experimental.pallas import tpu as pltpu


def _fused_forward_kernel(x_ref, w1_ref, b1_ref, w2_ref, b2_ref,
                          wih_ref, bih_ref, whh_ref, gmask_ref,
                          attw_ref, attb_ref, fcw_ref, fcb_ref, o_ref):
    f32 = jnp.float32
    bf16 = jnp.bfloat16
    B = x_ref.shape[0]
    H = whh_ref.shape[0] // 2

    # ---- Conv1d(k=3, pad=1) + folded BatchNorm(eval) + ReLU + MaxPool1d(2) ----
    # One im2col matmul per conv layer (3 taps collapsed into K = 3*Cin); BN scale
    # is already folded into the weights, so only a bias add remains. The pool is
    # a single reshape (pair up adjacent timesteps on the sublane axis) + max.
    def conv_bn_relu_pool(xin, w_bf, bias):
        Bb, L, Ci = xin.shape
        Co = w_bf.shape[-1]
        z = jnp.zeros((Bb, 1, Ci), f32)
        xm1 = jnp.concatenate([z, xin[:, :L - 1, :]], axis=1)      # x[l-1]
        xp1 = jnp.concatenate([xin[:, 1:, :], z], axis=1)          # x[l+1]
        xcat = jnp.concatenate([xm1, xin, xp1], axis=-1)           # (B, L, 3*Ci)
        y = jnp.dot(xcat.reshape(Bb * L, 3 * Ci).astype(bf16), w_bf,
                    preferred_element_type=f32)
        y = jnp.maximum(y + bias, 0.0)                             # (B*L, Co)
        return jnp.max(y.reshape(Bb, L // 2, 2, Co), axis=2)       # (B, L/2, Co)

    x = x_ref[...]                                        # (B, L0, Cin) — NLC (wrapper-transposed)
    y1 = conv_bn_relu_pool(x, w1_ref[...], b1_ref[...])   # (B, L0/2, 32)
    xp = conv_bn_relu_pool(y1, w2_ref[...], b2_ref[...])  # (B, T, 64)
    Bb, T, D = xp.shape

    # ---- bidirectional LSTM ----
    # Input projections hoisted out of the recurrence: one (B*T, D) @ (D, 8H) matmul.
    # Gate columns are pre-interleaved as [i_f, i_b, f_f, f_b, g_f, g_b, o_f, o_b].
    xg = (jnp.dot(xp.reshape(Bb * T, D).astype(bf16), wih_ref[...],
                  preferred_element_type=f32) + bih_ref[...]).reshape(Bb, T, 8 * H)

    is_fwd = gmask_ref[...] > 0.5                         # (1, 8H): True on fwd-gate columns
    whh = whh_ref[...]                                    # (2H, 8H) bf16, block-diag + interleaved

    h = jnp.zeros((B, 2 * H), f32)                        # [h_fwd | h_bwd]
    c = jnp.zeros((B, 2 * H), f32)
    hs = []
    for t in range(T):                                    # T = 4: static unroll is optimal
        # fwd direction consumes x[t]; bwd direction consumes x[T-1-t]
        gin = jnp.where(is_fwd, xg[:, t, :], xg[:, T - 1 - t, :])          # (B, 8H)
        g = gin + jnp.dot(h.astype(bf16), whh, preferred_element_type=f32)
        i_g = jax.nn.sigmoid(g[:, 0 * H:2 * H])           # torch gate order i, f, g, o
        f_g = jax.nn.sigmoid(g[:, 2 * H:4 * H])
        g_g = jnp.tanh(g[:, 4 * H:6 * H])
        o_g = jax.nn.sigmoid(g[:, 6 * H:8 * H])
        c = f_g * c + i_g * g_g
        h = o_g * jnp.tanh(c)
        hs.append(h)

    # (T, B, 2H): position t pairs fwd hidden of step t with bwd hidden of step T-1-t
    hs_f = jnp.stack(hs, axis=0)
    hs_b = jnp.stack(hs[::-1], axis=0)                    # Python list reversal: free
    lstm_out = jnp.concatenate([hs_f[:, :, :H], hs_b[:, :, H:]], axis=-1)

    # ---- attention softmax over time (axis 0, no transpose back) + fc ----
    logits = jnp.sum(lstm_out * attw_ref[...], axis=-1, keepdims=True) + attb_ref[...]
    e = jnp.exp(logits - jnp.max(logits, axis=0, keepdims=True))
    attn = e * pl.reciprocal(jnp.sum(e, axis=0, keepdims=True), approx=True)
    ctx = jnp.sum(attn * lstm_out, axis=0)                # (B, 2H)
    # TODO(synk): Dropout(0.3) omitted — identity in eval/inference mode.
    o_ref[...] = jnp.dot(ctx.astype(bf16), fcw_ref[...],
                         preferred_element_type=f32) + fcb_ref[...]


def respiratory_acoustic_forward(x, p):
    """x: (B, input_dim, L) float32 in PyTorch NCL layout."""
    x_nlc = jnp.transpose(x, (0, 2, 1))                   # NCL -> NLC: layout plumbing in the wrapper
    B = x.shape[0]
    num_classes = p["fc_b"].shape[-1]
    args = (x_nlc, p["conv1_w"], p["bn1_bias"], p["conv2_w"], p["bn2_bias"],
            p["w_ih_int"], p["b_int"], p["w_hh_blk"], p["gate_mask"],
            p["att_w"], p["att_b"], p["fc_w"], p["fc_b"])
    return pl.pallas_call(
        _fused_forward_kernel,
        out_shape=jax.ShapeDtypeStruct((B, num_classes), jnp.float32),
        in_specs=[pl.BlockSpec(memory_space=pltpu.MemorySpace.VMEM)] * len(args),
        out_specs=pl.BlockSpec(memory_space=pltpu.MemorySpace.VMEM),
    )(*args)


def init_params(key, input_dim=24, hidden_dim=64, num_classes=4):
    ks = jax.random.split(key, 24)
    rnd = lambda k, s, sc=0.1: (sc * jax.random.normal(k, s)).astype(jnp.float32)
    eps = 1e-5
    H = hidden_dim
    bf16 = jnp.bfloat16
    p = {}

    # Conv + eval-mode BN folding: w_fold = w * scale (per out-channel),
    # b_fold = (conv_b - running_mean) * scale + beta.
    # NOTE: weights are generated directly as (tap, Cin, Cout); a real PyTorch
    # checkpoint (Cout, Cin, k) must be permuted before the im2col reshape.
    def conv_bn(kw, kb, kg, kbeta, km, kv, cin, cout):
        w = rnd(kw, (3, cin, cout))
        b = rnd(kb, (cout,))
        gamma = 1.0 + rnd(kg, (cout,)); beta = rnd(kbeta, (cout,))
        mean = rnd(km, (cout,))
        var = 1.0 + 0.1 * jnp.abs(jax.random.normal(kv, (cout,))).astype(jnp.float32)
        scale = gamma / jnp.sqrt(var + eps)
        w_fold = (w.reshape(3 * cin, cout) * scale).astype(bf16)   # im2col weight, bf16 for MXU
        b_fold = ((b - mean) * scale + beta).reshape(1, cout)
        return w_fold, b_fold

    p["conv1_w"], p["bn1_bias"] = conv_bn(ks[0], ks[1], ks[2], ks[3], ks[4], ks[5], input_dim, 32)
    p["conv2_w"], p["bn2_bias"] = conv_bn(ks[6], ks[7], ks[8], ks[9], ks[10], ks[11], 32, 64)

    # bidirectional LSTM (input 64 -> hidden H), torch gate order i, f, g, o
    w_ih_f = rnd(ks[12], (64, 4 * H)); w_hh_f = rnd(ks[13], (H, 4 * H))
    b_f = rnd(ks[14], (4 * H,)) + rnd(ks[15], (4 * H,))            # b_ih + b_hh
    w_ih_b = rnd(ks[16], (64, 4 * H)); w_hh_b = rnd(ks[17], (H, 4 * H))
    b_b = rnd(ks[18], (4 * H,)) + rnd(ks[19], (4 * H,))

    # interleave gate columns at init time: [i_f, i_b, f_f, f_b, g_f, g_b, o_f, o_b]
    ih_cols, b_cols = [], []
    for gi in range(4):
        ih_cols += [w_ih_f[:, gi * H:(gi + 1) * H], w_ih_b[:, gi * H:(gi + 1) * H]]
        b_cols += [b_f[gi * H:(gi + 1) * H], b_b[gi * H:(gi + 1) * H]]
    p["w_ih_int"] = jnp.concatenate(ih_cols, axis=1).astype(bf16)  # (64, 8H)
    p["b_int"] = jnp.concatenate(b_cols).reshape(1, 8 * H)

    # block-diagonal recurrent weight, rows = [h_fwd | h_bwd], interleaved gate columns
    whh = jnp.zeros((2 * H, 8 * H), jnp.float32)
    for gi in range(4):
        whh = whh.at[0:H, 2 * gi * H:(2 * gi + 1) * H].set(w_hh_f[:, gi * H:(gi + 1) * H])
        whh = whh.at[H:2 * H, (2 * gi + 1) * H:(2 * gi + 2) * H].set(w_hh_b[:, gi * H:(gi + 1) * H])
    p["w_hh_blk"] = whh.astype(bf16)

    # 1.0 on forward-gate columns, 0.0 on backward-gate columns
    p["gate_mask"] = jnp.tile(
        jnp.concatenate([jnp.ones((H,), jnp.float32), jnp.zeros((H,), jnp.float32)]), 4
    ).reshape(1, 8 * H)

    # attention Linear(2H, 1) and fc Linear(2H, num_classes)
    p["att_w"] = rnd(ks[20], (2 * H,)).reshape(1, 1, 2 * H)
    p["att_b"] = rnd(ks[21], (1,)).reshape(1, 1, 1)
    p["fc_w"] = rnd(ks[22], (2 * H, num_classes)).astype(bf16)
    p["fc_b"] = rnd(ks[23], (1, num_classes))
    return p


if __name__ == "__main__":
    key = jax.random.PRNGKey(0)
    kx, kp = jax.random.split(key)
    # PyTorch input layout (B, C_in=24, L=16)
    x = jax.random.normal(kx, (2, 24, 16), dtype=jnp.float32)
    params = init_params(kp)
    fwd = jax.jit(respiratory_acoustic_forward)
    out = jax.block_until_ready(fwd(x, params))
    assert out.shape == (2, 4) and out.dtype == jnp.float32
    print("KERNEL_OK")
</pallas_src>

<mosaic_0001>
module attributes {stable_mosaic.version = 11 : i64} {
  func.func @_fused_forward_kernel(%arg0: memref<2x16x24xf32, #tpu.memory_space<vmem>>, %arg1: memref<72x32xbf16, #tpu.memory_space<vmem>>, %arg2: memref<1x32xf32, #tpu.memory_space<vmem>>, %arg3: memref<96x64xbf16, #tpu.memory_space<vmem>>, %arg4: memref<1x64xf32, #tpu.memory_space<vmem>>, %arg5: memref<64x512xbf16, #tpu.memory_space<vmem>>, %arg6: memref<1x512xf32, #tpu.memory_space<vmem>>, %arg7: memref<128x512xbf16, #tpu.memory_space<vmem>>, %arg8: memref<1x512xf32, #tpu.memory_space<vmem>>, %arg9: memref<1x1x128xf32, #tpu.memory_space<vmem>>, %arg10: memref<1x1x1xf32, #tpu.memory_space<vmem>>, %arg11: memref<128x4xbf16, #tpu.memory_space<vmem>>, %arg12: memref<1x4xf32, #tpu.memory_space<vmem>>, %arg13: memref<2x4xf32, #tpu.memory_space<vmem>>) attributes {dimension_semantics = [], scalar_prefetch = 0 : i64, scratch_operands = 0 : i64, tpu.core_type = #tpu.core_type<tc>} {
    %c0 = arith.constant 0 : index
    %c0_0 = arith.constant 0 : index
    %c0_1 = arith.constant 0 : index
    %0 = vector.load %arg0[%c0, %c0_0, %c0_1] : memref<2x16x24xf32, #tpu.memory_space<vmem>>, vector<2x16x24xf32>
    %c0_2 = arith.constant 0 : index
    %c0_3 = arith.constant 0 : index
    %1 = vector.load %arg1[%c0_2, %c0_3] : memref<72x32xbf16, #tpu.memory_space<vmem>>, vector<72x32xbf16>
    %c0_4 = arith.constant 0 : index
    %c0_5 = arith.constant 0 : index
    %2 = vector.load %arg2[%c0_4, %c0_5] : memref<1x32xf32, #tpu.memory_space<vmem>>, vector<1x32xf32>
    %cst = arith.constant 0.000000e+00 : f32
    %3 = vector.broadcast %cst : f32 to vector<2x1x24xf32>
    %4 = vector.extract_strided_slice %0 {offsets = [0, 0, 0], sizes = [2, 15, 24], strides = [1, 1, 1]} : vector<2x16x24xf32> to vector<2x15x24xf32>
    %5 = tpu.concatenate %3, %4 in 1 : vector<2x1x24xf32>, vector<2x15x24xf32> -> vector<2x16x24xf32>
    %6 = vector.extract_strided_slice %0 {offsets = [0, 1, 0], sizes = [2, 15, 24], strides = [1, 1, 1]} : vector<2x16x24xf32> to vector<2x15x24xf32>
    %7 = tpu.concatenate %6, %3 in 1 : vector<2x15x24xf32>, vector<2x1x24xf32> -> vector<2x16x24xf32>
    %8 = tpu.concatenate %5, %0, %7 in 2 : vector<2x16x24xf32>, vector<2x16x24xf32>, vector<2x16x24xf32> -> vector<2x16x72xf32>
    %9 = vector.shape_cast %8 : vector<2x16x72xf32> to vector<32x72xf32>
    %10 = arith.truncf %9 : vector<32x72xf32> to vector<32x72xbf16>
    %cst_6 = arith.constant dense<0.000000e+00> : vector<32x32xf32>
    %11 = tpu.matmul %10, %1, %cst_6 {dimension_numbers = #tpu.dot_dimension_numbers<[1], [0], [0], [1], [0, 0, 1, 1], [], []>} : vector<32x72xbf16>, vector<72x32xbf16>, vector<32x32xf32> -> vector<32x32xf32>
    %12 = vector.broadcast %2 : vector<1x32xf32> to vector<32x32xf32>
    %13 = arith.addf %11, %12 : vector<32x32xf32>
    %cst_7 = arith.constant 0.000000e+00 : f32
    %14 = vector.broadcast %cst_7 : f32 to vector<32x32xf32>
    %15 = arith.maximumf %13, %14 : vector<32x32xf32>
    %16 = vector.shape_cast %15 : vector<32x32xf32> to vector<2x8x2x32xf32>
    %cst_8 = arith.constant dense<0xFF800000> : vector<2x8x32xf32>
    %17 = vector.multi_reduction <maximumf>, %16, %cst_8 [2] : vector<2x8x2x32xf32> to vector<2x8x32xf32>
    %c0_9 = arith.constant 0 : index
    %c0_10 = arith.constant 0 : index
    %18 = vector.load %arg3[%c0_9, %c0_10] : memref<96x64xbf16, #tpu.memory_space<vmem>>, vector<96x64xbf16>
    %c0_11 = arith.constant 0 : index
    %c0_12 = arith.constant 0 : index
    %19 = vector.load %arg4[%c0_11, %c0_12] : memref<1x64xf32, #tpu.memory_space<vmem>>, vector<1x64xf32>
    %cst_13 = arith.constant 0.000000e+00 : f32
    %20 = vector.broadcast %cst_13 : f32 to vector<2x1x32xf32>
    %21 = vector.extract_strided_slice %17 {offsets = [0, 0, 0], sizes = [2, 7, 32], strides = [1, 1, 1]} : vector<2x8x32xf32> to vector<2x7x32xf32>
    %22 = tpu.concatenate %20, %21 in 1 : vector<2x1x32xf32>, vector<2x7x32xf32> -> vector<2x8x32xf32>
    %23 = vector.extract_strided_slice %17 {offsets = [0, 1, 0], sizes = [2, 7, 32], strides = [1, 1, 1]} : vector<2x8x32xf32> to vector<2x7x32xf32>
    %24 = tpu.concatenate %23, %20 in 1 : vector<2x7x32xf32>, vector<2x1x32xf32> -> vector<2x8x32xf32>
    %25 = tpu.concatenate %22, %17, %24 in 2 : vector<2x8x32xf32>, vector<2x8x32xf32>, vector<2x8x32xf32> -> vector<2x8x96xf32>
    %26 = vector.shape_cast %25 : vector<2x8x96xf32> to vector<16x96xf32>
    %27 = arith.truncf %26 : vector<16x96xf32> to vector<16x96xbf16>
    %cst_14 = arith.constant dense<0.000000e+00> : vector<16x64xf32>
    %28 = tpu.matmul %27, %18, %cst_14 {dimension_numbers = #tpu.dot_dimension_numbers<[1], [0], [0], [1], [0, 0, 1, 1], [], []>} : vector<16x96xbf16>, vector<96x64xbf16>, vector<16x64xf32> -> vector<16x64xf32>
    %29 = vector.broadcast %19 : vector<1x64xf32> to vector<16x64xf32>
    %30 = arith.addf %28, %29 : vector<16x64xf32>
    %cst_15 = arith.constant 0.000000e+00 : f32
    %31 = vector.broadcast %cst_15 : f32 to vector<16x64xf32>
    %32 = arith.maximumf %30, %31 : vector<16x64xf32>
    %33 = vector.shape_cast %32 : vector<16x64xf32> to vector<2x4x2x64xf32>
    %cst_16 = arith.constant dense<0xFF800000> : vector<2x4x64xf32>
    %34 = vector.multi_reduction <maximumf>, %33, %cst_16 [2] : vector<2x4x2x64xf32> to vector<2x4x64xf32>
    %35 = vector.shape_cast %34 : vector<2x4x64xf32> to vector<8x64xf32>
    %36 = arith.truncf %35 : vector<8x64xf32> to vector<8x64xbf16>
    %c0_17 = arith.constant 0 : index
    %c0_18 = arith.constant 0 : index
    %37 = vector.load %arg5[%c0_17, %c0_18] : memref<64x512xbf16, #tpu.memory_space<vmem>>, vector<64x512xbf16>
    %cst_19 = arith.constant dense<0.000000e+00> : vector<8x512xf32>
    %38 = tpu.matmul %36, %37, %cst_19 {dimension_numbers = #tpu.dot_dimension_numbers<[1], [0], [0], [1], [0, 0, 1, 1], [], []>} : vector<8x64xbf16>, vector<64x512xbf16>, vector<8x512xf32> -> vector<8x512xf32>
    %c0_20 = arith.constant 0 : index
    %c0_21 = arith.constant 0 : index
    %39 = vector.load %arg6[%c0_20, %c0_21] : memref<1x512xf32, #tpu.memory_space<vmem>>, vector<1x512xf32>
    %40 = vector.broadcast %39 : vector<1x512xf32> to vector<8x512xf32>
    %41 = arith.addf %38, %40 : vector<8x512xf32>
    %42 = vector.shape_cast %41 : vector<8x512xf32> to vector<2x4x512xf32>
    %c0_22 = arith.constant 0 : index
    %c0_23 = arith.constant 0 : index
    %43 = vector.load %arg8[%c0_22, %c0_23] : memref<1x512xf32, #tpu.memory_space<vmem>>, vector<1x512xf32>
    %cst_24 = arith.constant 5.000000e-01 : f32
    %44 = vector.broadcast %cst_24 : f32 to vector<1x512xf32>
    %45 = arith.cmpf ogt, %43, %44 : vector<1x512xf32>
    %c0_25 = arith.constant 0 : index
    %c0_26 = arith.constant 0 : index
    %46 = vector.load %arg7[%c0_25, %c0_26] : memref<128x512xbf16, #tpu.memory_space<vmem>>, vector<128x512xbf16>
    %cst_27 = arith.constant 0.000000e+00 : f32
    %47 = vector.broadcast %cst_27 : f32 to vector<2x128xf32>
    %cst_28 = arith.constant 0.000000e+00 : f32
    %48 = vector.broadcast %cst_28 : f32 to vector<2x128xf32>
    %49 = vector.extract_strided_slice %42 {offsets = [0, 0, 0], sizes = [2, 1, 512], strides = [1, 1, 1]} : vector<2x4x512xf32> to vector<2x1x512xf32>
    %50 = vector.shape_cast %49 : vector<2x1x512xf32> to vector<2x512xf32>
    %51 = vector.extract_strided_slice %42 {offsets = [0, 3, 0], sizes = [2, 1, 512], strides = [1, 1, 1]} : vector<2x4x512xf32> to vector<2x1x512xf32>
    %52 = vector.shape_cast %51 : vector<2x1x512xf32> to vector<2x512xf32>
    %53 = vector.shape_cast %45 : vector<1x512xi1> to vector<1x512xi1>
    %54 = vector.broadcast %53 : vector<1x512xi1> to vector<2x512xi1>
    %55 = arith.select %54, %50, %52 : vector<2x512xi1>, vector<2x512xf32>
    %56 = arith.truncf %47 : vector<2x128xf32> to vector<2x128xbf16>
    %cst_29 = arith.constant dense<0.000000e+00> : vector<2x512xf32>
    %57 = tpu.matmul %56, %46, %cst_29 {dimension_numbers = #tpu.dot_dimension_numbers<[1], [0], [0], [1], [0, 0, 1, 1], [], []>} : vector<2x128xbf16>, vector<128x512xbf16>, vector<2x512xf32> -> vector<2x512xf32>
    %58 = arith.addf %55, %57 : vector<2x512xf32>
    %59 = vector.extract_strided_slice %58 {offsets = [0, 0], sizes = [2, 128], strides = [1, 1]} : vector<2x512xf32> to vector<2x128xf32>
    %60 = arith.negf %59 : vector<2x128xf32>
    %61 = math.exp %60 : vector<2x128xf32>
    %cst_30 = arith.constant 1.000000e+00 : f32
    %62 = vector.broadcast %cst_30 : f32 to vector<2x128xf32>
    %63 = arith.addf %62, %61 : vector<2x128xf32>
    %64 = arith.divf %62, %63 : vector<2x128xf32>
    %65 = vector.extract_strided_slice %58 {offsets = [0, 128], sizes = [2, 128], strides = [1, 1]} : vector<2x512xf32> to vector<2x128xf32>
    %66 = arith.negf %65 : vector<2x128xf32>
    %67 = math.exp %66 : vector<2x128xf32>
    %cst_31 = arith.constant 1.000000e+00 : f32
    %68 = vector.broadcast %cst_31 : f32 to vector<2x128xf32>
    %69 = arith.addf %68, %67 : vector<2x128xf32>
    %70 = arith.divf %68, %69 : vector<2x128xf32>
    %71 = vector.extract_strided_slice %58 {offsets = [0, 256], sizes = [2, 128], strides = [1, 1]} : vector<2x512xf32> to vector<2x128xf32>
    %72 = math.tanh %71 : vector<2x128xf32>
    %73 = vector.extract_strided_slice %58 {offsets = [0, 384], sizes = [2, 128], strides = [1, 1]} : vector<2x512xf32> to vector<2x128xf32>
    %74 = arith.negf %73 : vector<2x128xf32>
    %75 = math.exp %74 : vector<2x128xf32>
    %cst_32 = arith.constant 1.000000e+00 : f32
    %76 = vector.broadcast %cst_32 : f32 to vector<2x128xf32>
    %77 = arith.addf %76, %75 : vector<2x128xf32>
    %78 = arith.divf %76, %77 : vector<2x128xf32>
    %79 = arith.mulf %70, %48 : vector<2x128xf32>
    %80 = arith.mulf %64, %72 : vector<2x128xf32>
    %81 = arith.addf %79, %80 : vector<2x128xf32>
    %82 = math.tanh %81 : vector<2x128xf32>
    %83 = arith.mulf %78, %82 : vector<2x128xf32>
    %84 = vector.extract_strided_slice %42 {offsets = [0, 1, 0], sizes = [2, 1, 512], strides = [1, 1, 1]} : vector<2x4x512xf32> to vector<2x1x512xf32>
    %85 = vector.shape_cast %84 : vector<2x1x512xf32> to vector<2x512xf32>
    %86 = vector.extract_strided_slice %42 {offsets = [0, 2, 0], sizes = [2, 1, 512], strides = [1, 1, 1]} : vector<2x4x512xf32> to vector<2x1x512xf32>
    %87 = vector.shape_cast %86 : vector<2x1x512xf32> to vector<2x512xf32>
    %88 = vector.shape_cast %45 : vector<1x512xi1> to vector<1x512xi1>
    %89 = vector.broadcast %88 : vector<1x512xi1> to vector<2x512xi1>
    %90 = arith.select %89, %85, %87 : vector<2x512xi1>, vector<2x512xf32>
    %91 = arith.truncf %83 : vector<2x128xf32> to vector<2x128xbf16>
    %cst_33 = arith.constant dense<0.000000e+00> : vector<2x512xf32>
    %92 = tpu.matmul %91, %46, %cst_33 {dimension_numbers = #tpu.dot_dimension_numbers<[1], [0], [0], [1], [0, 0, 1, 1], [], []>} : vector<2x128xbf16>, vector<128x512xbf16>, vector<2x512xf32> -> vector<2x512xf32>
    %93 = arith.addf %90, %92 : vector<2x512xf32>
    %94 = vector.extract_strided_slice %93 {offsets = [0, 0], sizes = [2, 128], strides = [1, 1]} : vector<2x512xf32> to vector<2x128xf32>
    %95 = arith.negf %94 : vector<2x128xf32>
    %96 = math.exp %95 : vector<2x128xf32>
    %cst_34 = arith.constant 1.000000e+00 : f32
    %97 = vector.broadcast %cst_34 : f32 to vector<2x128xf32>
    %98 = arith.addf %97, %96 : vector<2x128xf32>
    %99 = arith.divf %97, %98 : vector<2x128xf32>
    %100 = vector.extract_strided_slice %93 {offsets = [0, 128], sizes = [2, 128], strides = [1, 1]} : vector<2x512xf32> to vector<2x128xf32>
    %101 = arith.negf %100 : vector<2x128xf32>
    %102 = math.exp %101 : vector<2x128xf32>
    %cst_35 = arith.constant 1.000000e+00 : f32
    %103 = vector.broadcast %cst_35 : f32 to vector<2x128xf32>
    %104 = arith.addf %103, %102 : vector<2x128xf32>
    %105 = arith.divf %103, %104 : vector<2x128xf32>
    %106 = vector.extract_strided_slice %93 {offsets = [0, 256], sizes = [2, 128], strides = [1, 1]} : vector<2x512xf32> to vector<2x128xf32>
    %107 = math.tanh %106 : vector<2x128xf32>
    %108 = vector.extract_strided_slice %93 {offsets = [0, 384], sizes = [2, 128], strides = [1, 1]} : vector<2x512xf32> to vector<2x128xf32>
    %109 = arith.negf %108 : vector<2x128xf32>
    %110 = math.exp %109 : vector<2x128xf32>
    %cst_36 = arith.constant 1.000000e+00 : f32
    %111 = vector.broadcast %cst_36 : f32 to vector<2x128xf32>
    %112 = arith.addf %111, %110 : vector<2x128xf32>
    %113 = arith.divf %111, %112 : vector<2x128xf32>
    %114 = arith.mulf %105, %81 : vector<2x128xf32>
    %115 = arith.mulf %99, %107 : vector<2x128xf32>
    %116 = arith.addf %114, %115 : vector<2x128xf32>
    %117 = math.tanh %116 : vector<2x128xf32>
    %118 = arith.mulf %113, %117 : vector<2x128xf32>
    %119 = vector.extract_strided_slice %42 {offsets = [0, 2, 0], sizes = [2, 1, 512], strides = [1, 1, 1]} : vector<2x4x512xf32> to vector<2x1x512xf32>
    %120 = vector.shape_cast %119 : vector<2x1x512xf32> to vector<2x512xf32>
    %121 = vector.extract_strided_slice %42 {offsets = [0, 1, 0], sizes = [2, 1, 512], strides = [1, 1, 1]} : vector<2x4x512xf32> to vector<2x1x512xf32>
    %122 = vector.shape_cast %121 : vector<2x1x512xf32> to vector<2x512xf32>
    %123 = vector.shape_cast %45 : vector<1x512xi1> to vector<1x512xi1>
    %124 = vector.broadcast %123 : vector<1x512xi1> to vector<2x512xi1>
    %125 = arith.select %124, %120, %122 : vector<2x512xi1>, vector<2x512xf32>
    %126 = arith.truncf %118 : vector<2x128xf32> to vector<2x128xbf16>
    %cst_37 = arith.constant dense<0.000000e+00> : vector<2x512xf32>
    %127 = tpu.matmul %126, %46, %cst_37 {dimension_numbers = #tpu.dot_dimension_numbers<[1], [0], [0], [1], [0, 0, 1, 1], [], []>} : vector<2x128xbf16>, vector<128x512xbf16>, vector<2x512xf32> -> vector<2x512xf32>
    %128 = arith.addf %125, %127 : vector<2x512xf32>
    %129 = vector.extract_strided_slice %128 {offsets = [0, 0], sizes = [2, 128], strides = [1, 1]} : vector<2x512xf32> to vector<2x128xf32>
    %130 = arith.negf %129 : vector<2x128xf32>
    %131 = math.exp %130 : vector<2x128xf32>
    %cst_38 = arith.constant 1.000000e+00 : f32
    %132 = vector.broadcast %cst_38 : f32 to vector<2x128xf32>
    %133 = arith.addf %132, %131 : vector<2x128xf32>
    %134 = arith.divf %132, %133 : vector<2x128xf32>
    %135 = vector.extract_strided_slice %128 {offsets = [0, 128], sizes = [2, 128], strides = [1, 1]} : vector<2x512xf32> to vector<2x128xf32>
    %136 = arith.negf %135 : vector<2x128xf32>
    %137 = math.exp %136 : vector<2x128xf32>
    %cst_39 = arith.constant 1.000000e+00 : f32
    %138 = vector.broadcast %cst_39 : f32 to vector<2x128xf32>
    %139 = arith.addf %138, %137 : vector<2x128xf32>
    %140 = arith.divf %138, %139 : vector<2x128xf32>
    %141 = vector.extract_strided_slice %128 {offsets = [0, 256], sizes = [2, 128], strides = [1, 1]} : vector<2x512xf32> to vector<2x128xf32>
    %142 = math.tanh %141 : vector<2x128xf32>
    %143 = vector.extract_strided_slice %128 {offsets = [0, 384], sizes = [2, 128], strides = [1, 1]} : vector<2x512xf32> to vector<2x128xf32>
    %144 = arith.negf %143 : vector<2x128xf32>
    %145 = math.exp %144 : vector<2x128xf32>
    %cst_40 = arith.constant 1.000000e+00 : f32
    %146 = vector.broadcast %cst_40 : f32 to vector<2x128xf32>
    %147 = arith.addf %146, %145 : vector<2x128xf32>
    %148 = arith.divf %146, %147 : vector<2x128xf32>
    %149 = arith.mulf %140, %116 : vector<2x128xf32>
    %150 = arith.mulf %134, %142 : vector<2x128xf32>
    %151 = arith.addf %149, %150 : vector<2x128xf32>
    %152 = math.tanh %151 : vector<2x128xf32>
    %153 = arith.mulf %148, %152 : vector<2x128xf32>
    %154 = vector.extract_strided_slice %42 {offsets = [0, 3, 0], sizes = [2, 1, 512], strides = [1, 1, 1]} : vector<2x4x512xf32> to vector<2x1x512xf32>
    %155 = vector.shape_cast %154 : vector<2x1x512xf32> to vector<2x512xf32>
    %156 = vector.extract_strided_slice %42 {offsets = [0, 0, 0], sizes = [2, 1, 512], strides = [1, 1, 1]} : vector<2x4x512xf32> to vector<2x1x512xf32>
    %157 = vector.shape_cast %156 : vector<2x1x512xf32> to vector<2x512xf32>
    %158 = vector.shape_cast %45 : vector<1x512xi1> to vector<1x512xi1>
    %159 = vector.broadcast %158 : vector<1x512xi1> to vector<2x512xi1>
    %160 = arith.select %159, %155, %157 : vector<2x512xi1>, vector<2x512xf32>
    %161 = arith.truncf %153 : vector<2x128xf32> to vector<2x128xbf16>
    %cst_41 = arith.constant dense<0.000000e+00> : vector<2x512xf32>
    %162 = tpu.matmul %161, %46, %cst_41 {dimension_numbers = #tpu.dot_dimension_numbers<[1], [0], [0], [1], [0, 0, 1, 1], [], []>} : vector<2x128xbf16>, vector<128x512xbf16>, vector<2x512xf32> -> vector<2x512xf32>
    %163 = arith.addf %160, %162 : vector<2x512xf32>
    %164 = vector.extract_strided_slice %163 {offsets = [0, 0], sizes = [2, 128], strides = [1, 1]} : vector<2x512xf32> to vector<2x128xf32>
    %165 = arith.negf %164 : vector<2x128xf32>
    %166 = math.exp %165 : vector<2x128xf32>
    %cst_42 = arith.constant 1.000000e+00 : f32
    %167 = vector.broadcast %cst_42 : f32 to vector<2x128xf32>
    %168 = arith.addf %167, %166 : vector<2x128xf32>
    %169 = arith.divf %167, %168 : vector<2x128xf32>
    %170 = vector.extract_strided_slice %163 {offsets = [0, 128], sizes = [2, 128], strides = [1, 1]} : vector<2x512xf32> to vector<2x128xf32>
    %171 = arith.negf %170 : vector<2x128xf32>
    %172 = math.exp %171 : vector<2x128xf32>
    %cst_43 = arith.constant 1.000000e+00 : f32
    %173 = vector.broadcast %cst_43 : f32 to vector<2x128xf32>
    %174 = arith.addf %173, %172 : vector<2x128xf32>
    %175 = arith.divf %173, %174 : vector<2x128xf32>
    %176 = vector.extract_strided_slice %163 {offsets = [0, 256], sizes = [2, 128], strides = [1, 1]} : vector<2x512xf32> to vector<2x128xf32>
    %177 = math.tanh %176 : vector<2x128xf32>
    %178 = vector.extract_strided_slice %163 {offsets = [0, 384], sizes = [2, 128], strides = [1, 1]} : vector<2x512xf32> to vector<2x128xf32>
    %179 = arith.negf %178 : vector<2x128xf32>
    %180 = math.exp %179 : vector<2x128xf32>
    %cst_44 = arith.constant 1.000000e+00 : f32
    %181 = vector.broadcast %cst_44 : f32 to vector<2x128xf32>
    %182 = arith.addf %181, %180 : vector<2x128xf32>
    %183 = arith.divf %181, %182 : vector<2x128xf32>
    %184 = arith.mulf %175, %151 : vector<2x128xf32>
    %185 = arith.mulf %169, %177 : vector<2x128xf32>
    %186 = arith.addf %184, %185 : vector<2x128xf32>
    %187 = math.tanh %186 : vector<2x128xf32>
    %188 = arith.mulf %183, %187 : vector<2x128xf32>
    %189 = vector.shape_cast %83 : vector<2x128xf32> to vector<1x2x128xf32>
    %190 = vector.shape_cast %118 : vector<2x128xf32> to vector<1x2x128xf32>
    %191 = vector.shape_cast %153 : vector<2x128xf32> to vector<1x2x128xf32>
    %192 = vector.shape_cast %188 : vector<2x128xf32> to vector<1x2x128xf32>
    %193 = tpu.concatenate %189, %190, %191, %192 in 0 : vector<1x2x128xf32>, vector<1x2x128xf32>, vector<1x2x128xf32>, vector<1x2x128xf32> -> vector<4x2x128xf32>
    %194 = vector.shape_cast %188 : vector<2x128xf32> to vector<1x2x128xf32>
    %195 = vector.shape_cast %153 : vector<2x128xf32> to vector<1x2x128xf32>
    %196 = vector.shape_cast %118 : vector<2x128xf32> to vector<1x2x128xf32>
    %197 = vector.shape_cast %83 : vector<2x128xf32> to vector<1x2x128xf32>
    %198 = tpu.concatenate %194, %195, %196, %197 in 0 : vector<1x2x128xf32>, vector<1x2x128xf32>, vector<1x2x128xf32>, vector<1x2x128xf32> -> vector<4x2x128xf32>
    %199 = vector.extract_strided_slice %193 {offsets = [0, 0, 0], sizes = [4, 2, 64], strides = [1, 1, 1]} : vector<4x2x128xf32> to vector<4x2x64xf32>
    %200 = vector.extract_strided_slice %198 {offsets = [0, 0, 64], sizes = [4, 2, 64], strides = [1, 1, 1]} : vector<4x2x128xf32> to vector<4x2x64xf32>
    %201 = tpu.concatenate %199, %200 in 2 : vector<4x2x64xf32>, vector<4x2x64xf32> -> vector<4x2x128xf32>
    %c0_45 = arith.constant 0 : index
    %c0_46 = arith.constant 0 : index
    %c0_47 = arith.constant 0 : index
    %202 = vector.load %arg9[%c0_45, %c0_46, %c0_47] : memref<1x1x128xf32, #tpu.memory_space<vmem>>, vector<1x1x128xf32>
    %203 = vector.broadcast %202 : vector<1x1x128xf32> to vector<4x2x128xf32>
    %204 = arith.mulf %201, %203 : vector<4x2x128xf32>
    %cst_48 = arith.constant dense<0.000000e+00> : vector<4x2xf32>
    %205 = vector.multi_reduction <add>, %204, %cst_48 [2] : vector<4x2x128xf32> to vector<4x2xf32>
    %206 = vector.shape_cast %205 : vector<4x2xf32> to vector<4x2x1xf32>
    %c0_49 = arith.constant 0 : index
    %c0_50 = arith.constant 0 : index
    %c0_51 = arith.constant 0 : index
    %207 = vector.load %arg10[%c0_49, %c0_50, %c0_51] : memref<1x1x1xf32, #tpu.memory_space<vmem>>, vector<1x1x1xf32>
    %208 = vector.broadcast %207 : vector<1x1x1xf32> to vector<4x2x1xf32>
    %209 = arith.addf %206, %208 : vector<4x2x1xf32>
    %cst_52 = arith.constant dense<0xFF800000> : vector<2x1xf32>
    %210 = vector.multi_reduction <maximumf>, %209, %cst_52 [0] : vector<4x2x1xf32> to vector<2x1xf32>
    %211 = vector.shape_cast %210 : vector<2x1xf32> to vector<1x2x1xf32>
    %212 = vector.broadcast %211 : vector<1x2x1xf32> to vector<4x2x1xf32>
    %213 = arith.subf %209, %212 : vector<4x2x1xf32>
    %214 = math.exp %213 : vector<4x2x1xf32>
    %cst_53 = arith.constant dense<0.000000e+00> : vector<2x1xf32>
    %215 = vector.multi_reduction <add>, %214, %cst_53 [0] : vector<4x2x1xf32> to vector<2x1xf32>
    %216 = vector.shape_cast %215 : vector<2x1xf32> to vector<1x2x1xf32>
    %217 = tpu.reciprocal %216 {approx = true} : vector<1x2x1xf32> -> vector<1x2x1xf32>
    %218 = vector.broadcast %217 : vector<1x2x1xf32> to vector<4x2x1xf32>
    %219 = arith.mulf %214, %218 : vector<4x2x1xf32>
    %220 = vector.broadcast %219 : vector<4x2x1xf32> to vector<4x2x128xf32>
    %221 = arith.mulf %220, %201 : vector<4x2x128xf32>
    %cst_54 = arith.constant dense<0.000000e+00> : vector<2x128xf32>
    %222 = vector.multi_reduction <add>, %221, %cst_54 [0] : vector<4x2x128xf32> to vector<2x128xf32>
    %223 = arith.truncf %222 : vector<2x128xf32> to vector<2x128xbf16>
    %c0_55 = arith.constant 0 : index
    %c0_56 = arith.constant 0 : index
    %224 = vector.load %arg11[%c0_55, %c0_56] : memref<128x4xbf16, #tpu.memory_space<vmem>>, vector<128x4xbf16>
    %cst_57 = arith.constant dense<0.000000e+00> : vector<2x4xf32>
    %225 = tpu.matmul %223, %224, %cst_57 {dimension_numbers = #tpu.dot_dimension_numbers<[1], [0], [0], [1], [0, 0, 1, 1], [], []>} : vector<2x128xbf16>, vector<128x4xbf16>, vector<2x4xf32> -> vector<2x4xf32>
    %c0_58 = arith.constant 0 : index
    %c0_59 = arith.constant 0 : index
    %226 = vector.load %arg12[%c0_58, %c0_59] : memref<1x4xf32, #tpu.memory_space<vmem>>, vector<1x4xf32>
    %227 = vector.broadcast %226 : vector<1x4xf32> to vector<2x4xf32>
    %228 = arith.addf %225, %227 : vector<2x4xf32>
    %c0_60 = arith.constant 0 : index
    %c0_61 = arith.constant 0 : index
    %229 = vector.load %arg13[%c0_60, %c0_61] : memref<2x4xf32, #tpu.memory_space<vmem>>, vector<2x4xf32>
    tpu.vector_store %arg13[%c0_60, %c0_61], %228 {strides = array<i32>} : memref<2x4xf32, #tpu.memory_space<vmem>>, vector<2x4xf32>,
    return
  }
}

</mosaic_0001>

<bundles_post_ra>
// kernel: respiratory_acoustic_forward.1
= control target key start
LH: loop header
LB: loop body
LE: loop exit
PB: predicated region body
PF: predicated region fallthrough
CT: control target
= control target key end

     0   :  { %s3163_s0 = inlined_call_operand.vmem [shape: f32[2,16,24], index: 0, kind: input, shape index: {}]   ;;  %s3164_s1 = inlined_call_operand.vmem [shape: bf16[72,32], index: 1, kind: input, shape index: {}]   ;;  %s3165_s2 = inlined_call_operand.vmem [shape: f32[1,32], index: 2, kind: input, shape index: {}]   ;;  %s3166_s3 = inlined_call_operand.vmem [shape: bf16[96,64], index: 3, kind: input, shape index: {}]   ;;  %s3167_s4 = inlined_call_operand.vmem [shape: f32[1,64], index: 4, kind: input, shape index: {}]   ;;  %s3168_s5 = inlined_call_operand.vmem [shape: bf16[64,512], index: 5, kind: input, shape index: {}]   ;;  %s3169_s6 = inlined_call_operand.vmem [shape: f32[1,512], index: 6, kind: input, shape index: {}]   ;;  %s3170_s7 = inlined_call_operand.hbm [shape: bf16[128,512], index: 7, kind: input, shape index: {}]   ;;  %s3171_s8 = inlined_call_operand.vmem [shape: f32[1,512], index: 8, kind: input, shape index: {}]   ;;  %s3172_s9 = inlined_call_operand.vmem [shape: f32[1,1,128], index: 9, kind: input, shape index: {}]   ;;  %s3173_s10 = inlined_call_operand.<no memory space> [shape: f32[1,1,1], index: 10, kind: input, shape index: {}]   ;;  %s3174_s11 = inlined_call_operand.vmem [shape: bf16[128,4], index: 11, kind: input, shape index: {}]   ;;  %s3175_s12 = inlined_call_operand.vmem [shape: f32[1,4], index: 12, kind: input, shape index: {}]   ;;  %s3176_s13 = inlined_call_operand.hbm [shape: f32[2,4], index: 13, kind: output, shape index: {}]  }
   0x1   :  { %v18_v0 = vstv %s3173_s10 }
   0x2   :  { %19 = vst [vmem:[#allocation2] sm:$0x1] %v18_v0 }
   0x3   :  { %20 = vsyncpa [#allocation4], 0 }
   0x4   :  { %21 = vsyncpa [#allocation5], 0  ;;  %s40_s29 = sshll.u32 %s3170_s7, 4  ;;  %s2268_s30 = smov [#allocation3]   ;;  %s41_s29 = int_to_ptr.hbm [resolvable:$true] %s40_s29 }
   0x5   :  { %s42_s14 = sshll.u32 %s2268_s30, 4  ;;  %s2269_s15 = smov 256   ;;  %s43_s14 = int_to_ptr.vmem [resolvable:$true] %s42_s14 }
   0x6   :  { %s2270_s16 = smov 16  }
   0x7   :  { %48 = dma.hbm_to_vmem [thread:$0]  %s41_s29, 4096, %s43_s14, [#allocation4], %s2269_s15, %s2269_s15, %s2270_s16  }
   0x8   :  { %2264 = dma.done.wait [#allocation4], 4096  }
   0x9   :  { %2265 = vsyncadd [#allocation4], 4294963200  ;;  %v64_v1 = vld [vmem:[%s3163_s0] sm:$0xff]  ;;  %v65_v2 = vld [vmem:[%s3163_s0 + $0x8] sm:$0xff]  ;;  %vm95_vm0 = vcmask 1046528   ;;  %s2271_s25 = smov 24  }
   0xa   :  { %v66_v3 = vld [vmem:[%s3163_s0 + $0x10] sm:$0xff]  ;;  %v97_v4 = vrot.slane %v65_v2, 1  ;;  %v2104_v5 = vpack.i.bf16 %v65_v2, %v64_v1  ;;  %v67_v6 = vld [vmem:[%s3163_s0 + $0x18] sm:$0xff]  ;;  %v76_v7 = vld [vmem:[%s3164_s1 + $0x20] sm:$0xf]  ;;  %v96_v8 = vrot.slane %v64_v1, 1 }
   0xb   :  { %v100_v9 = vrot.slane %v67_v6, 1  ;;  %v2114_v10 = vpack.i.bf16 %v67_v6, %v66_v3  ;;  %v99_v11 = vrot.slane %v66_v3, 1  ;;  %v164_v14 = vunpack.c.l.b16 %v76_v7  ;;  %v2032_v21 = vld [vmem:[%s3164_s1 + $0x18] sm:$0xff]  ;;  %s2272_s27 = smov 48   ;;  %v2031_v25 = vld [vmem:[%s3164_s1 + $0x10] sm:$0xff]  ;;  %v2030_v26 = vld [vmem:[%s3164_s1 + $0x8] sm:$0xff] }
   0xc   :  { %2105 = vrot.lane.b32.xlu0 %v2104_v5, %s2271_s25  ;;  %v98_v12 = vsel %vm95_vm0, %v96_v8, %v97_v4  ;;  %v104_v13 = vsel %vm95_vm0, %v97_v4, 0.0  ;;  %vm181_vm1 = vcmask 1043456   ;;  %v84_v22 = vrot.slane %v65_v2, 7  ;;  %v2029_v30 = vld [vmem:[%s3164_s1] sm:$0xff]  ;;  %s2273_s7 = smov 32   ;;  %s2274_s22 = smov 64  }
   0xd   :  { %2115 = vrot.lane.b32.xlu1 %v2114_v10, %s2271_s25  ;;  %v101_v15 = vsel %vm95_vm0, %v99_v11, %v100_v9  ;;  %v105_v16 = vsel %vm95_vm0, %v100_v9, 0.0  ;;  %v169_v17 = vpack.c.b16 %v164_v14, %v164_v14  ;;  %v2109_v18 = vpack.i.bf16 %v104_v13, %v98_v12  ;;  %v2392_v55 = vld [vmem:[%s3165_s2] ss:$0 sm:$0xff]  ;;  %s2276_s19 = smov [#allocation6]  }
   0xe   :  { %v2119_v19 = vpack.i.bf16 %v105_v16, %v101_v15  ;;  %v83_v23 = vrot.slane %v64_v1, 7  ;;  %vm82_vm2 = vcmask 1040384   ;;  %v87_v27 = vrot.slane %v67_v6, 7  ;;  %s1734_s20 = sshll.u32 %s2276_s19, 4  ;;  %s1735_s20 = int_to_ptr.vmem [resolvable:$true] %s1734_s20 }
   0xf   :  { %v183_v20 = vsel %vm181_vm1, %v169_v17, 0  ;;  %v86_v28 = vrot.slane %v66_v3, 7  ;;  %vm132_vm3 = vcmask 195584   ;;  %vm137_vm4 = vcmask 392192  }
  0x10   :  { %188 = vmatpush.bf16.msra.mxu0 %v183_v20  ;;  %v85_v24 = vsel %vm82_vm2, %v83_v23, %v84_v22  ;;  %v93_v38 = vsel %vm82_vm2, 0.0, %v83_v23  ;;  %vm174_vm5 = vcmask 588800   ;;  %vm236_vm6 = vcmask 254976  }
  0x11   :  { %v88_v29 = vsel %vm82_vm2, %v86_v28, %v87_v27  ;;  %v94_v35 = vsel %vm82_vm2, 0.0, %v86_v28  ;;  %vm376_vm7 = vcmask 1042434   ;;  %vm400_vm8 = vcmask 1041409  }
  0x12   :  { %vm378_vm9 = vcmask 1043459   ;;  %vm380_vm10 = vcmask 1044484   ;;  %vm384_vm11 = vcmask 1046534   ;;  %vm382_vm12 = vcmask 1045509  }
  0x13   :  { %vm386_vm13 = vcmask 1047559   ;;  %vm445_vm14 = vcmask 261120   ;;  %vm448_vm15 = vcmask 523264  }
  0x14   :  { %2110 = vrot.lane.b32.xlu0 %v2109_v18, %s2272_s27  ;;  %189 = vmatpush.bf16.msra.mxu0 %v2032_v21 }
  0x15   :  { %2120 = vrot.lane.b32.xlu1 %v2119_v19, %s2272_s27 }
  0x18   :  { %190 = vmatpush.bf16.msra.mxu0 %v2031_v25 }
  0x1c   :  { %191 = vmatpush.bf16.msra.mxu0 %v2030_v26 }
  0x20   :  { %192 = vmatpush.bf16.msra.mxu0 %v2029_v30 }
  0x7e   :  { %v2106_v31 = vpop.permute.xlu0 %2105 }
  0x7f   :  { %v2116_v32 = vpop.permute.xlu1 %2115  ;;  %v2108_v36 = vunpack.i.h.bf16 %v2106_v31  ;;  %v2107_v37 = vunpack.i.l.bf16 %v2106_v31 }
  0x80   :  { %v2118_v33 = vunpack.i.h.bf16 %v2116_v32  ;;  %v2117_v34 = vunpack.i.l.bf16 %v2116_v32 }
  0x81   :  { %v133_v45 = vsel %vm132_vm3, %v93_v38, %v2107_v37  ;;  %v134_v46 = vsel %vm132_vm3, %v85_v24, %v2108_v36 }
  0x82   :  { %v135_v42 = vsel %vm132_vm3, %v94_v35, %v2117_v34  ;;  %v136_v43 = vsel %vm132_vm3, %v88_v29, %v2118_v33  ;;  %vm525_vm3 = vcmask 517120  }
  0x86   :  { %v2111_v39 = vpop.permute.xlu0 %2110 }
  0x87   :  { %v2113_v40 = vunpack.i.h.bf16 %v2111_v39  ;;  %v2112_v41 = vunpack.i.l.bf16 %v2111_v39  ;;  %v2121_v44 = vpop.permute.xlu1 %2120 }
  0x88   :  { %v2123_v47 = vunpack.i.h.bf16 %v2121_v44  ;;  %v2122_v48 = vunpack.i.l.bf16 %v2121_v44 }
  0x89   :  { %v138_v49 = vsel %vm137_vm4, %v133_v45, %v2112_v41  ;;  %v139_v50 = vsel %vm137_vm4, %v134_v46, %v2113_v40 }
  0x8a   :  { %v142_v51 = vpack.c.bf16 %v139_v50, %v138_v49  ;;  %v140_v52 = vsel %vm137_vm4, %v135_v42, %v2122_v48  ;;  %v141_v53 = vsel %vm137_vm4, %v136_v43, %v2123_v47 }
  0x8b   :  { %v143_v54 = vpack.c.bf16 %v141_v53, %v140_v52 }
  0x8c   :  { %1762 = vmatmul.msk.bf16.vlgmr.msra.gmra.mxu0 %vm174_vm5, %v142_v51 }
  0x9c   :  { %1763 = vmatmul.msk.bf16.gmra.mxu0 %vm174_vm5, %v143_v54 }
 0x109   :  { %v194_v56 = vpop.f32.mrf.mxu0 }
 0x10a   :  { %v195_v57 = vadd.f32 %v2392_v55, %v194_v56 }
 0x10c   :  { %v204_v58 = vmax.f32 %v195_v57, 0.0 }
 0x10e   :  { %v212_v59 = vrot.slane %v204_v58, 2  ;;  %v213_v60 = vrot.slane %v204_v58, 4  ;;  %v214_v61 = vrot.slane %v204_v58, 6  ;;  %v237_v62 = vsel %vm236_vm6, %v204_v58, -inf }
 0x10f   :  { %v238_v63 = vrot.slane %v237_v62, 4 }
 0x110   :  { %v244_v0 = vsel %vm236_vm6, %v212_v59, -inf  ;;  %v251_v1 = vsel %vm236_vm6, %v213_v60, -inf  ;;  %v258_v2 = vsel %vm236_vm6, %v214_v61, -inf }
 0x111   :  { %v239_v3 = vmax.f32 %v237_v62, %v238_v63  ;;  %v245_v4 = vrot.slane %v244_v0, 4  ;;  %v252_v5 = vrot.slane %v251_v1, 4  ;;  %v259_v6 = vrot.slane %v258_v2, 4  ;;  %v196_v7 = vpop.f32.mrf.mxu0 }
 0x112   :  { %v197_v8 = vadd.f32 %v2392_v55, %v196_v7 }
 0x113   :  { %v240_v9 = vrot.slane %v239_v3, 2  ;;  %v246_v10 = vmax.f32 %v244_v0, %v245_v4  ;;  %v253_v11 = vmax.f32 %v251_v1, %v252_v5  ;;  %v260_v12 = vmax.f32 %v258_v2, %v259_v6 }
 0x114   :  { %v205_v13 = vmax.f32 %v197_v8, 0.0 }
 0x115   :  { %v241_v14 = vmax.f32 %v239_v3, %v240_v9  ;;  %v247_v15 = vrot.slane %v246_v10, 2  ;;  %v254_v16 = vrot.slane %v253_v11, 2  ;;  %v261_v17 = vrot.slane %v260_v12, 2 }
 0x116   :  { %v215_v18 = vrot.slane %v205_v13, 2  ;;  %v216_v19 = vrot.slane %v205_v13, 4  ;;  %v217_v20 = vrot.slane %v205_v13, 6  ;;  %v265_v21 = vsel %vm236_vm6, %v205_v13, -inf  ;;  %v2038_v13 = vld [vmem:[%s3166_s3 + $0x28] sm:$0xff] }
 0x117   :  { %v242_v22 = vrot.slane %v241_v14, 1  ;;  %v248_v23 = vmax.f32 %v246_v10, %v247_v15  ;;  %v255_v24 = vmax.f32 %v253_v11, %v254_v16  ;;  %v262_v25 = vmax.f32 %v260_v12, %v261_v17  ;;  %497 = vmatpush.bf16.msra.mxu1 %v2038_v13 }
 0x118   :  { %v266_v26 = vrot.slane %v265_v21, 4  ;;  %v272_v27 = vsel %vm236_vm6, %v215_v18, -inf  ;;  %v279_v28 = vsel %vm236_vm6, %v216_v19, -inf  ;;  %v286_v29 = vsel %vm236_vm6, %v217_v20, -inf }
 0x119   :  { %v249_v30 = vrot.slane %v248_v23, 1  ;;  %v256_v31 = vrot.slane %v255_v24, 1  ;;  %v199_v32 = vpop.f32.mrf.mxu0  ;;  %v273_v34 = vrot.slane %v272_v27, 4  ;;  %v280_v35 = vrot.slane %v279_v28, 4 }
 0x11a   :  { %v267_v33 = vmax.f32 %v265_v21, %v266_v26  ;;  %v287_v36 = vrot.slane %v286_v29, 4  ;;  %v243_v37 = vmax.f32 %v241_v14, %v242_v22  ;;  %v263_v39 = vrot.slane %v262_v25, 1  ;;  %v2037_v21 = vld [vmem:[%s3166_s3 + $0x20] sm:$0xff] }
 0x11b   :  { %v250_v38 = vmax.f32 %v248_v23, %v249_v30  ;;  %v200_v40 = vadd.f32 %v2392_v55, %v199_v32  ;;  %v274_v42 = vmax.f32 %v272_v27, %v273_v34  ;;  %v281_v43 = vmax.f32 %v279_v28, %v280_v35  ;;  %498 = vmatpush.bf16.msra.mxu1 %v2037_v21 }
 0x11c   :  { %v268_v41 = vrot.slane %v267_v33, 2  ;;  %v288_v44 = vmax.f32 %v286_v29, %v287_v36  ;;  %v2408_v47 = vmax.f32 %v255_v24, %v256_v31  ;;  %v2411_v58 = vmax.f32 %v262_v25, %v263_v39 }
 0x11d   :  { %v2406_v45 = vsel %vm376_vm7, %v250_v38, %v243_v37  ;;  %v206_v46 = vmax.f32 %v200_v40, 0.0  ;;  %v275_v49 = vrot.slane %v274_v42, 2  ;;  %v282_v50 = vrot.slane %v281_v43, 2 }
 0x11e   :  { %v269_v48 = vmax.f32 %v267_v33, %v268_v41  ;;  %v289_v59 = vrot.slane %v288_v44, 2  ;;  %v417_v7 = vsel %vm400_vm8, %v250_v38, %v243_v37  ;;  %v2420_v8 = vsel %vm400_vm8, %v2408_v47, %v250_v38  ;;  %v2036_v38 = vld [vmem:[%s3166_s3 + $0x18] sm:$0xff] }
 0x11f   :  { %v218_v51 = vrot.slane %v206_v46, 2  ;;  %v219_v52 = vrot.slane %v206_v46, 4  ;;  %v220_v53 = vrot.slane %v206_v46, 6  ;;  %v293_v54 = vsel %vm236_vm6, %v206_v46, -inf  ;;  %499 = vmatpush.bf16.msra.mxu1 %v2036_v38 }
 0x120   :  { %v270_v56 = vrot.slane %v269_v48, 1  ;;  %v294_v57 = vrot.slane %v293_v54, 4  ;;  %v276_v0 = vmax.f32 %v274_v42, %v275_v49  ;;  %v283_v6 = vmax.f32 %v281_v43, %v282_v50 }
 0x121   :  { %v300_v60 = vsel %vm236_vm6, %v218_v51, -inf  ;;  %v307_v61 = vsel %vm236_vm6, %v219_v52, -inf  ;;  %v314_v62 = vsel %vm236_vm6, %v220_v53, -inf  ;;  %v201_v63 = vpop.f32.mrf.mxu0 }
 0x122   :  { %v295_v1 = vmax.f32 %v293_v54, %v294_v57  ;;  %v301_v2 = vrot.slane %v300_v60, 4  ;;  %v308_v3 = vrot.slane %v307_v61, 4  ;;  %v315_v4 = vrot.slane %v314_v62, 4 }
 0x123   :  { %v202_v5 = vadd.f32 %v2392_v55, %v201_v63  ;;  %v2425_v15 = vmax.f32 %v269_v48, %v270_v56  ;;  %v277_v16 = vrot.slane %v276_v0, 1  ;;  %v2427_v55 = vmax.f32 %v288_v44, %v289_v59 }
 0x124   :  { %v296_v9 = vrot.slane %v295_v1, 2  ;;  %v302_v10 = vmax.f32 %v300_v60, %v301_v2  ;;  %v309_v11 = vmax.f32 %v307_v61, %v308_v3  ;;  %v316_v12 = vmax.f32 %v314_v62, %v315_v4 }
 0x125   :  { %v207_v14 = vmax.f32 %v202_v5, 0.0  ;;  %v2436_v36 = vmax.f32 %v276_v0, %v277_v16  ;;  %v284_v37 = vrot.slane %v283_v6, 1  ;;  %v418_v56 = vsel %vm376_vm7, %v2408_v47, %v417_v7 }
 0x126   :  { %v297_v17 = vmax.f32 %v295_v1, %v296_v9  ;;  %v303_v18 = vrot.slane %v302_v10, 2  ;;  %v310_v19 = vrot.slane %v309_v11, 2  ;;  %v317_v20 = vrot.slane %v316_v12, 2 }
 0x127   :  { %v221_v22 = vrot.slane %v207_v14, 2  ;;  %v222_v23 = vrot.slane %v207_v14, 4  ;;  %v223_v24 = vrot.slane %v207_v14, 6  ;;  %v321_v25 = vsel %vm236_vm6, %v207_v14, -inf }
 0x128   :  { %v298_v26 = vrot.slane %v297_v17, 1  ;;  %v304_v27 = vmax.f32 %v302_v10, %v303_v18  ;;  %v311_v28 = vmax.f32 %v309_v11, %v310_v19  ;;  %v318_v29 = vmax.f32 %v316_v12, %v317_v20 }
 0x129   :  { %v322_v30 = vrot.slane %v321_v25, 4  ;;  %v328_v31 = vsel %vm236_vm6, %v221_v22, -inf  ;;  %v335_v32 = vsel %vm236_vm6, %v222_v23, -inf  ;;  %v342_v33 = vsel %vm236_vm6, %v223_v24, -inf }
 0x12a   :  { %v305_v34 = vrot.slane %v304_v27, 1  ;;  %v312_v35 = vrot.slane %v311_v28, 1  ;;  %v329_v40 = vrot.slane %v328_v31, 4  ;;  %v336_v41 = vrot.slane %v335_v32, 4 }
 0x12b   :  { %v323_v39 = vmax.f32 %v321_v25, %v322_v30  ;;  %v343_v42 = vrot.slane %v342_v33, 4  ;;  %v299_v43 = vmax.f32 %v297_v17, %v298_v26  ;;  %v319_v48 = vrot.slane %v318_v29, 1 }
 0x12c   :  { %v306_v44 = vmax.f32 %v304_v27, %v305_v34  ;;  %v313_v46 = vmax.f32 %v311_v28, %v312_v35  ;;  %v330_v50 = vmax.f32 %v328_v31, %v329_v40  ;;  %v337_v51 = vmax.f32 %v335_v32, %v336_v41 }
 0x12d   :  { %v324_v49 = vrot.slane %v323_v39, 2  ;;  %v344_v52 = vmax.f32 %v342_v33, %v343_v42  ;;  %v285_v54 = vmax.f32 %v283_v6, %v284_v37  ;;  %v320_v63 = vmax.f32 %v318_v29, %v319_v48 }
 0x12e   :  { %v388_v53 = vsel %vm376_vm7, %v306_v44, %v299_v43  ;;  %v424_v57 = vsel %vm400_vm8, %v306_v44, %v299_v43  ;;  %v331_v60 = vrot.slane %v330_v50, 2  ;;  %v338_v61 = vrot.slane %v337_v51, 2 }
 0x12f   :  { %v325_v59 = vmax.f32 %v323_v39, %v324_v49  ;;  %v345_v62 = vrot.slane %v344_v52, 2  ;;  %v419_v0 = vsel %vm378_vm9, %v2411_v58, %v418_v56  ;;  %v425_v1 = vsel %vm376_vm7, %v313_v46, %v424_v57  ;;  %v2033_v49 = vld [vmem:[%s3166_s3] sm:$0xff] }
 0x130   :  { %v402_v2 = vsel %vm376_vm7, %v2411_v58, %v2420_v8  ;;  %v332_v4 = vmax.f32 %v330_v50, %v331_v60  ;;  %v339_v5 = vmax.f32 %v337_v51, %v338_v61  ;;  %v291_v7 = vrot.slane %v2427_v55, 1 }
 0x131   :  { %v326_v3 = vrot.slane %v325_v59, 1  ;;  %v346_v6 = vmax.f32 %v344_v52, %v345_v62  ;;  %v420_v9 = vsel %vm380_vm10, %v2425_v15, %v419_v0  ;;  %v403_v10 = vsel %vm378_vm9, %v2425_v15, %v402_v2  ;;  %v1839_v2 = vld [vmem:[%s3168_s5 + $0x60] sm:$0xf] }
 0x132   :  { %v407_v11 = vsel %vm400_vm8, %v313_v46, %v306_v44  ;;  %v333_v13 = vrot.slane %v332_v4, 1  ;;  %v340_v14 = vrot.slane %v339_v5, 1  ;;  %v421_v8 = vsel %vm382_vm12, %v2436_v36, %v420_v9  ;;  %v2049_v9 = vld [vmem:[%s3168_s5 + $0x4c] sm:$0xf0] }
 0x133   :  { %v327_v12 = vmax.f32 %v325_v59, %v326_v3  ;;  %v347_v16 = vrot.slane %v346_v6, 1  ;;  %v426_v17 = vsel %vm378_vm9, %v320_v63, %v425_v1  ;;  %v389_v18 = vsel %vm378_vm9, %v313_v46, %v388_v53  ;;  %v2509_v1 = vld [vmem:[%s3167_s4] ss:$0 sm:$0xff]  ;;  %v2053_v3 = vld [vmem:[%s3168_s5 + $0x6c] sm:$0xf0] }
 0x134   :  { %v334_v19 = vmax.f32 %v332_v4, %v333_v13  ;;  %v341_v20 = vmax.f32 %v339_v5, %v340_v14  ;;  %v422_v21 = vsel %vm384_vm11, %v285_v54, %v421_v8  ;;  %v408_v22 = vsel %vm376_vm7, %v320_v63, %v407_v11  ;;  %v2051_v4 = vld [vmem:[%s3168_s5 + $0x64] sm:$0xf]  ;;  %v1807_v13 = vld [vmem:[%s3168_s5 + $0x20] sm:$0xf]  ;;  %v2045_v8 = vld [vmem:[%s3168_s5 + $0x2c] sm:$0xf0] }
 0x135   :  { %v292_v23 = vmax.f32 %v2427_v55, %v291_v7  ;;  %v427_v24 = vsel %vm380_vm10, %v327_v12, %v426_v17  ;;  %v404_v25 = vsel %vm380_vm10, %v2436_v36, %v403_v10  ;;  %v409_v26 = vsel %vm378_vm9, %v327_v12, %v408_v22  ;;  %v1823_v7 = vld [vmem:[%s3168_s5 + $0x40] sm:$0xf]  ;;  %v2047_v11 = vld [vmem:[%s3168_s5 + $0x44] sm:$0xf]  ;;  %v2085_v22 = vld [vmem:[#allocation3 + $0xec] sm:$0xf0] }
 0x136   :  { %v348_v27 = vmax.f32 %v346_v6, %v347_v16  ;;  %v428_v28 = vsel %vm382_vm12, %v334_v19, %v427_v24  ;;  %v410_v29 = vsel %vm380_vm10, %v334_v19, %v409_v26  ;;  %v390_v30 = vsel %vm380_vm10, %v320_v63, %v389_v18  ;;  %v1841_v6 = vld [vmem:[%s3168_s5 + $0x70] sm:$0xf0]  ;;  %v2043_v17 = vld [vmem:[%s3168_s5 + $0x24] sm:$0xf]  ;;  %v1791_v26 = vld [vmem:[%s3168_s5] sm:$0xf] }
 0x137   :  { %v423_v31 = vsel %vm386_vm13, %v292_v23, %v422_v21  ;;  %v429_v32 = vsel %vm384_vm11, %v341_v20, %v428_v28  ;;  %v391_v55 = vsel %vm382_vm12, %v327_v12, %v390_v30  ;;  %v379_v33 = vsel %vm378_vm9, %v2408_v47, %v2406_v45  ;;  %v1825_v12 = vld [vmem:[%s3168_s5 + $0x50] sm:$0xf0]  ;;  %v1971_v21 = vld [vmem:[#allocation3 + $0xe0] sm:$0xf] }
 0x138   :  { %v430_v34 = vsel %vm386_vm13, %v348_v27, %v429_v32  ;;  %v411_v35 = vsel %vm382_vm12, %v341_v20, %v410_v29  ;;  %v392_v37 = vsel %vm384_vm11, %v334_v19, %v391_v55  ;;  %v381_v38 = vsel %vm380_vm10, %v2411_v58, %v379_v33  ;;  %v1809_v18 = vld [vmem:[%s3168_s5 + $0x30] sm:$0xf0]  ;;  %v2039_v30 = vld [vmem:[%s3168_s5 + $0x4] sm:$0xf]  ;;  %v1847_v33 = vld [vmem:[%s3168_s5 + $0x68] sm:$0xf] }
 0x139   :  { %v2124_v39 = vpack.i.bf16 %v430_v34, %v423_v31  ;;  %v393_v40 = vsel %vm386_vm13, %v341_v20, %v392_v37  ;;  %v383_v41 = vsel %vm382_vm12, %v2425_v15, %v381_v38  ;;  %v405_v42 = vsel %vm382_vm12, %v285_v54, %v404_v25  ;;  %v2035_v15 = vld [vmem:[%s3166_s3 + $0x10] sm:$0xff]  ;;  %v2054_v34 = vld [vmem:[%s3168_s5 + $0x74] sm:$0xf0] }
 0x13a   :  { %v385_v45 = vsel %vm384_vm11, %v2436_v36, %v383_v41  ;;  %v412_v47 = vsel %vm384_vm11, %v348_v27, %v411_v35  ;;  %v406_v44 = vsel %vm384_vm11, %v292_v23, %v405_v42  ;;  %500 = vmatpush.bf16.msra.mxu1 %v2035_v15  ;;  %v2034_v36 = vld [vmem:[%s3166_s3 + $0x8] sm:$0xff]  ;;  %v1840_v5 = vor.u32 %v2053_v3, %v1839_v2  ;;  %v1973_v25 = vld [vmem:[#allocation3 + $0xf0] sm:$0xf0]  ;;  %v2041_v27 = vld [vmem:[%s3168_s5 + $0xc] sm:$0xf0] }
 0x13b   :  { %2125 = vrot.lane.b32.xlu2 %v2124_v39, %s2273_s7  ;;  %v387_v43 = vsel %vm386_vm13, %v285_v54, %v385_v45  ;;  %v416_v58 = vsel %vm95_vm0, %v412_v47, 0.0  ;;  %v415_v46 = vsel %vm95_vm0, %v406_v44, 0.0  ;;  %v397_v54 = vsel %vm82_vm2, 0.0, %v393_v40  ;;  %v2083_v23 = vld [vmem:[#allocation3 + $0xe4] sm:$0xf] }
 0x13c   :  { %v2129_v48 = vpack.i.bf16 %v416_v58, %v415_v46  ;;  %v396_v56 = vsel %vm82_vm2, 0.0, %v387_v43  ;;  %vm491_vm0 = vcmask 785408   ;;  %v1844_v10 = vor.u32 %v2051_v4, %v1841_v6  ;;  %727 = vmatpush.bf16.msra.mxu2 %v1840_v5  ;;  %v1793_v31 = vld [vmem:[%s3168_s5 + $0x10] sm:$0xf0]  ;;  %v2052_v35 = vld [vmem:[%s3168_s5 + $0x6c] sm:$0xf] }
 0x13d   :  { %v1824_v16 = vor.u32 %v2049_v9, %v1823_v7  ;;  %v1828_v20 = vor.u32 %v2047_v11, %v1825_v12  ;;  %v2548_v24 = vor.u32 %v2085_v22, %v1971_v21  ;;  %v2556_v29 = vor.u32 %v2083_v23, %v1973_v25  ;;  %v1849_v41 = vld [vmem:[%s3168_s5 + $0x78] sm:$0xf0]  ;;  %v1955_v44 = vld [vmem:[#allocation3 + $0xc0] sm:$0xf]  ;;  %v2081_v58 = vld [vmem:[#allocation3 + $0xcc] sm:$0xf0] }
 0x13e   :  { %501 = vmatpush.bf16.msra.mxu1 %v2034_v36  ;;  %740 = vmatpush.bf16.msra.mxu3 %v1844_v10  ;;  %v1808_v32 = vor.u32 %v2045_v8, %v1807_v13  ;;  %v1812_v55 = vor.u32 %v2043_v17, %v1809_v18  ;;  %v1792_v45 = vor.u32 %v2041_v27, %v1791_v26  ;;  %v1833_v4 = vld [vmem:[%s3168_s5 + $0x58] sm:$0xf0] }
 0x13f   :  { %1026 = vmatpush.bf16.msrb.mxu0 %v2548_v24  ;;  %v1796_v47 = vor.u32 %v2039_v30, %v1793_v31  ;;  %v1848_v43 = vor.u32 %v2054_v34, %v1847_v33  ;;  %v2582_v36 = vor.u32 %v2081_v58, %v1955_v44  ;;  %v1941_v44 = vld [vmem:[#allocation3 + $0xb0] sm:$0xf0]  ;;  %v1815_v58 = vld [vmem:[%s3168_s5 + $0x28] sm:$0xf] }
 0x140   :  { %728 = vmatpush.bf16.msra.mxu2 %v1824_v16 }
 0x142   :  { %502 = vmatpush.bf16.msra.mxu1 %v2033_v49  ;;  %741 = vmatpush.bf16.msra.mxu3 %v1828_v20  ;;  %v2079_v49 = vld [vmem:[#allocation3 + $0xc4] sm:$0xf] }
 0x143   :  { %2130 = vrot.lane.b32.xlu2 %v2129_v48, %s2274_s22  ;;  %1027 = vmatpush.bf16.msrb.mxu0 %v2582_v36  ;;  %s1736_s22 = sshll.u32 %s3176_s13, 4  ;;  %s1737_s22 = int_to_ptr.hbm [resolvable:$true] %s1736_s22 }
 0x144   :  { %729 = vmatpush.bf16.msra.mxu2 %v1808_v32 }
 0x146   :  { %1039 = vmatpush.bf16.msrb.mxu1 %v2556_v29  ;;  %742 = vmatpush.bf16.msra.mxu3 %v1812_v55 }
 0x148   :  { %730 = vmatpush.bf16.msra.mxu2 %v1792_v45 }
 0x14a   :  { %743 = vmatpush.bf16.msra.mxu3 %v1796_v47 }
 0x14c   :  { %753 = vmatpush.bf16.msrb.mxu2 %v1848_v43  ;;  %v2075_v43 = vld [vmem:[#allocation3 + $0xa4] sm:$0xf] }
 0x195   :  { %v2126_v50 = vpop.permute.xlu2 %2125 }
 0x196   :  { %v2128_v51 = vunpack.i.h.bf16 %v2126_v50  ;;  %v2127_v52 = vunpack.i.l.bf16 %v2126_v50 }
 0x198   :  { %v447_v60 = vsel %vm445_vm14, %v397_v54, %v2128_v51  ;;  %v446_v61 = vsel %vm445_vm14, %v396_v56, %v2127_v52  ;;  %v1957_v56 = vld [vmem:[#allocation3 + $0xd0] sm:$0xf0] }
 0x19d   :  { %v2131_v53 = vpop.permute.xlu2 %2130 }
 0x19e   :  { %v2133_v57 = vunpack.i.h.bf16 %v2131_v53  ;;  %v2132_v59 = vunpack.i.l.bf16 %v2131_v53 }
 0x1a0   :  { %v449_v62 = vsel %vm448_vm15, %v446_v61, %v2132_v59  ;;  %v450_v63 = vsel %vm448_vm15, %v447_v60, %v2133_v57  ;;  %v1852_v59 = vor.u32 %v2052_v35, %v1849_v41  ;;  %v2586_v60 = vor.u32 %v2079_v49, %v1957_v56  ;;  %v1831_v61 = vld [vmem:[%s3168_s5 + $0x48] sm:$0xf]  ;;  %v2046_v49 = vld [vmem:[%s3168_s5 + $0x34] sm:$0xf0] }
 0x1a1   :  { %v451_v0 = vpack.c.bf16 %v450_v63, %v449_v62  ;;  %v2050_v62 = vld [vmem:[%s3168_s5 + $0x54] sm:$0xf0]  ;;  %v2048_v63 = vld [vmem:[%s3168_s5 + $0x4c] sm:$0xf] }
 0x1a2   :  { %1040 = vmatpush.bf16.msrb.mxu1 %v2586_v60  ;;  %v1832_v6 = vor.u32 %v2050_v62, %v1831_v61  ;;  %v1836_v7 = vor.u32 %v2048_v63, %v1833_v4  ;;  %766 = vmatpush.bf16.msrb.mxu3 %v1852_v59 }
 0x1a3   :  { %1788 = vmatmul.msk.bf16.vlgmr.msra.gmra.mxu1 %vm491_vm0, %v451_v0 }
 0x1a4   :  { %754 = vmatpush.bf16.msrb.mxu2 %v1832_v6 }
 0x1a6   :  { %767 = vmatpush.bf16.msrb.mxu3 %v1836_v7  ;;  %v1799_v7 = vld [vmem:[%s3168_s5 + $0x8] sm:$0xf] }
 0x220   :  { %v504_v14 = vpop.f32.mrf.mxu1 }
 0x221   :  { %v505_v19 = vadd.f32 %v2509_v1, %v504_v14 }
 0x223   :  { %v509_v28 = vmax.f32 %v505_v19, 0.0 }
 0x225   :  { %v513_v37 = vrot.slane %v509_v28, 2  ;;  %v514_v38 = vrot.slane %v509_v28, 4  ;;  %v515_v39 = vrot.slane %v509_v28, 6  ;;  %v526_v40 = vsel %vm525_vm3, %v509_v28, -inf }
 0x226   :  { %v527_v42 = vrot.slane %v526_v40, 4 }
 0x227   :  { %v533_v46 = vsel %vm525_vm3, %v513_v37, -inf  ;;  %v540_v48 = vsel %vm525_vm3, %v514_v38, -inf  ;;  %v547_v15 = vsel %vm525_vm3, %v515_v39, -inf  ;;  %v1939_v39 = vld [vmem:[#allocation3 + $0xa0] sm:$0xf] }
 0x228   :  { %v528_v50 = vmax.f32 %v526_v40, %v527_v42  ;;  %v534_v51 = vrot.slane %v533_v46, 4  ;;  %v541_v52 = vrot.slane %v540_v48, 4  ;;  %v548_v53 = vrot.slane %v547_v15, 4  ;;  %v506_v54 = vpop.f32.mrf.mxu1  ;;  %v2077_v40 = vld [vmem:[#allocation3 + $0xac] sm:$0xf0] }
 0x229   :  { %v507_v57 = vadd.f32 %v2509_v1, %v506_v54  ;;  %v2617_v63 = vor.u32 %v2077_v40, %v1939_v39  ;;  %v1891_v40 = vld [vmem:[#allocation3 + $0x40] sm:$0xf] }
 0x22a   :  { %v529_v0 = vrot.slane %v528_v50, 2  ;;  %v535_v1 = vmax.f32 %v533_v46, %v534_v51  ;;  %v542_v2 = vmax.f32 %v540_v48, %v541_v52  ;;  %v549_v3 = vmax.f32 %v547_v15, %v548_v53  ;;  %v1817_v51 = vld [vmem:[%s3168_s5 + $0x38] sm:$0xf0] }
 0x22b   :  { %v510_v5 = vmax.f32 %v507_v57, 0.0  ;;  %v1923_v57 = vld [vmem:[#allocation3 + $0x80] sm:$0xf]  ;;  %1028 = vmatpush.bf16.msrb.mxu0 %v2617_v63 }
 0x22c   :  { %v530_v9 = vmax.f32 %v528_v50, %v529_v0  ;;  %v536_v10 = vrot.slane %v535_v1, 2  ;;  %v543_v11 = vrot.slane %v542_v2, 2  ;;  %v550_v12 = vrot.slane %v549_v3, 2  ;;  %v2044_v50 = vld [vmem:[%s3168_s5 + $0x2c] sm:$0xf] }
 0x22d   :  { %v516_v13 = vrot.slane %v510_v5, 2  ;;  %v517_v14 = vrot.slane %v510_v5, 4  ;;  %v518_v16 = vrot.slane %v510_v5, 6  ;;  %v554_v8 = vsel %vm525_vm3, %v510_v5, -inf  ;;  %v2073_v0 = vld [vmem:[#allocation3 + $0x8c] sm:$0xf0] }
 0x22e   :  { %v531_v17 = vrot.slane %v530_v9, 1  ;;  %v537_v18 = vmax.f32 %v535_v1, %v536_v10  ;;  %v544_v19 = vmax.f32 %v542_v2, %v543_v11  ;;  %v551_v20 = vmax.f32 %v549_v3, %v550_v12  ;;  %v2071_v1 = vld [vmem:[#allocation3 + $0x84] sm:$0xf]  ;;  %v1925_v2 = vld [vmem:[#allocation3 + $0x90] sm:$0xf0] }
 0x22f   :  { %v555_v21 = vrot.slane %v554_v8, 4  ;;  %v561_v22 = vsel %vm525_vm3, %v516_v13, -inf  ;;  %v568_v23 = vsel %vm525_vm3, %v517_v14, -inf  ;;  %v575_v25 = vsel %vm525_vm3, %v518_v16, -inf }
 0x230   :  { %v532_v26 = vmax.f32 %v530_v9, %v531_v17  ;;  %v538_v27 = vrot.slane %v537_v18, 1  ;;  %v545_v28 = vrot.slane %v544_v19, 1  ;;  %v552_v30 = vrot.slane %v551_v20, 1  ;;  %v2042_v9 = vld [vmem:[%s3168_s5 + $0x14] sm:$0xf0] }
 0x231   :  { %v556_v31 = vmax.f32 %v554_v8, %v555_v21  ;;  %v562_v32 = vrot.slane %v561_v22, 4  ;;  %v569_v55 = vrot.slane %v568_v23, 4  ;;  %v576_v33 = vrot.slane %v575_v25, 4 }
 0x232   :  { %v539_v34 = vmax.f32 %v537_v18, %v538_v27  ;;  %v546_v35 = vmax.f32 %v544_v19, %v545_v28  ;;  %v553_v37 = vmax.f32 %v551_v20, %v552_v30  ;;  %v582_v38 = vpack.c.bf16 %v532_v26, %v532_v26  ;;  %v2040_v18 = vld [vmem:[%s3168_s5 + $0xc] sm:$0xf]  ;;  %v1801_v19 = vld [vmem:[%s3168_s5 + $0x18] sm:$0xf0] }
 0x233   :  { %v557_v41 = vrot.slane %v556_v31, 2  ;;  %v563_v42 = vmax.f32 %v561_v22, %v562_v32  ;;  %v570_v45 = vmax.f32 %v568_v23, %v569_v55  ;;  %v577_v47 = vmax.f32 %v575_v25, %v576_v33  ;;  %v1907_v23 = vld [vmem:[#allocation3 + $0x60] sm:$0xf]  ;;  %v2069_v25 = vld [vmem:[#allocation3 + $0x6c] sm:$0xf0] }
 0x234   :  { %v583_v46 = vpack.c.bf16 %v539_v34, %v539_v34  ;;  %v584_v48 = vpack.c.bf16 %v546_v35, %v546_v35  ;;  %v585_v15 = vpack.c.bf16 %v553_v37, %v553_v37  ;;  %v624_v59 = vunpack.c.l.b16 %v582_v38  ;;  %v1909_v32 = vld [vmem:[#allocation3 + $0x70] sm:$0xf0] }
 0x235   :  { %v558_v52 = vmax.f32 %v556_v31, %v557_v41  ;;  %v564_v53 = vrot.slane %v563_v42, 2  ;;  %v571_v54 = vrot.slane %v570_v45, 2  ;;  %v578_v56 = vrot.slane %v577_v47, 2  ;;  %v2067_v31 = vld [vmem:[#allocation3 + $0x64] sm:$0xf] }
 0x236   :  { %v625_v61 = vunpack.c.l.b16 %v583_v46  ;;  %v626_v62 = vunpack.c.l.b16 %v584_v48  ;;  %v2627_v11 = vor.u32 %v2075_v43, %v1941_v44  ;;  %v1816_v12 = vor.u32 %v2046_v49, %v1815_v58  ;;  %v2065_v41 = vld [vmem:[#allocation3 + $0x4c] sm:$0xf0]  ;;  %v1979_v46 = vld [vmem:[#allocation3 + $0xe8] sm:$0xf]  ;;  %v2086_v48 = vld [vmem:[#allocation3 + $0xf4] sm:$0xf0] }
 0x237   :  { %v559_v3 = vrot.slane %v558_v52, 1  ;;  %v565_v4 = vmax.f32 %v563_v42, %v564_v53  ;;  %v572_v5 = vmax.f32 %v570_v45, %v571_v54  ;;  %v579_v6 = vmax.f32 %v577_v47, %v578_v56  ;;  %v1981_v49 = vld [vmem:[#allocation3 + $0xf8] sm:$0xf0]  ;;  %v1893_v54 = vld [vmem:[#allocation3 + $0x50] sm:$0xf0] }
 0x238   :  { %v632_v10 = vsel %vm400_vm8, %v625_v61, %v624_v59  ;;  %v1820_v13 = vor.u32 %v2044_v50, %v1817_v51  ;;  %v2629_v17 = vor.u32 %v2073_v0, %v1923_v57  ;;  %1041 = vmatpush.bf16.msrb.mxu1 %v2627_v11  ;;  %755 = vmatpush.bf16.msrb.mxu2 %v1816_v12  ;;  %v627_v55 = vunpack.c.l.b16 %v585_v15  ;;  %v2084_v15 = vld [vmem:[#allocation3 + $0xec] sm:$0xf]  ;;  %v2063_v51 = vld [vmem:[#allocation3 + $0x44] sm:$0xf]  ;;  %v1875_v56 = vld [vmem:[#allocation3 + $0x20] sm:$0xf] }
 0x239   :  { %v560_v14 = vmax.f32 %v558_v52, %v559_v3  ;;  %v566_v16 = vrot.slane %v565_v4, 1  ;;  %v573_v8 = vrot.slane %v572_v5, 1  ;;  %v2638_v20 = vor.u32 %v2071_v1, %v1925_v2  ;;  %v2061_v57 = vld [vmem:[#allocation3 + $0x2c] sm:$0xf0]  ;;  %v1963_v1 = vld [vmem:[#allocation3 + $0xc8] sm:$0xf] }
 0x23a   :  { %v580_v21 = vrot.slane %v579_v6, 1  ;;  %v1800_v22 = vor.u32 %v2042_v9, %v1799_v7  ;;  %768 = vmatpush.bf16.msrb.mxu3 %v1820_v13  ;;  %v633_v30 = vsel %vm376_vm7, %v626_v62, %v632_v10  ;;  %1029 = vmatpush.bf16.msrb.mxu0 %v2629_v17  ;;  %v1804_v34 = vor.u32 %v2040_v18, %v1801_v19  ;;  %v2082_v2 = vld [vmem:[#allocation3 + $0xd4] sm:$0xf0]  ;;  %v2080_v3 = vld [vmem:[#allocation3 + $0xcc] sm:$0xf] }
 0x23b   :  { %v567_v26 = vmax.f32 %v565_v4, %v566_v16  ;;  %v586_v27 = vpack.c.bf16 %v560_v14, %v560_v14  ;;  %v574_v28 = vmax.f32 %v572_v5, %v573_v8  ;;  %v2642_v39 = vor.u32 %v2069_v25, %v1907_v23  ;;  %v1965_v5 = vld [vmem:[#allocation3 + $0xd8] sm:$0xf0]  ;;  %v2059_v9 = vld [vmem:[#allocation3 + $0x24] sm:$0xf]  ;;  %v1877_v10 = vld [vmem:[#allocation3 + $0x30] sm:$0xf0] }
 0x23c   :  { %v581_v33 = vmax.f32 %v579_v6, %v580_v21  ;;  %1042 = vmatpush.bf16.msrb.mxu1 %v2638_v20  ;;  %v634_v45 = vsel %vm378_vm9, %v627_v55, %v633_v30  ;;  %756 = vmatpush.bf16.msrb.mxu2 %v1800_v22  ;;  %v2646_v47 = vor.u32 %v2067_v31, %v1909_v32  ;;  %v1859_v12 = vld [vmem:[#allocation3] sm:$0xf]  ;;  %v2057_v13 = vld [vmem:[#allocation3 + $0xc] sm:$0xf0]  ;;  %v2275_v14 = vmov 0  }
 0x23d   :  { %v587_v35 = vpack.c.bf16 %v567_v26, %v567_v26  ;;  %v628_v37 = vunpack.c.l.b16 %v586_v27  ;;  %v588_v38 = vpack.c.bf16 %v574_v28, %v574_v28  ;;  %v2650_v50 = vor.u32 %v2065_v41, %v1891_v40  ;;  %2136 = vset.pattern.permute.xlu2 %v2275_v14  ;;  %2135 = vset.pattern.permute.xlu1 %v2275_v14  ;;  %v1947_v18 = vld [vmem:[#allocation3 + $0xa8] sm:$0xf]  ;;  %v2078_v19 = vld [vmem:[#allocation3 + $0xb4] sm:$0xf0]  ;;  %v2076_v21 = vld [vmem:[#allocation3 + $0xac] sm:$0xf] }
 0x23e   :  { %v589_v42 = vpack.c.bf16 %v581_v33, %v581_v33  ;;  %769 = vmatpush.bf16.msrb.mxu3 %v1804_v34  ;;  %1030 = vmatpush.bf16.msrb.mxu0 %v2642_v39  ;;  %v2656_v62 = vor.u32 %v2086_v48, %v1979_v46  ;;  %v2658_v0 = vor.u32 %v2084_v15, %v1981_v49  ;;  %v1949_v22 = vld [vmem:[#allocation3 + $0xb8] sm:$0xf0]  ;;  %v2055_v26 = vld [vmem:[#allocation3 + $0x4] sm:$0xf]  ;;  %v1861_v27 = vld [vmem:[#allocation3 + $0x10] sm:$0xf0] }
 0x23f   :  { %v629_v43 = vunpack.c.l.b16 %v587_v35  ;;  %v630_v44 = vunpack.c.l.b16 %v588_v38  ;;  %v635_v58 = vsel %vm380_vm10, %v628_v37, %v634_v45  ;;  %v2663_v6 = vor.u32 %v2063_v51, %v1893_v54  ;;  %2134 = vset.pattern.permute.xlu0 %v2275_v14  ;;  %v1931_v31 = vld [vmem:[#allocation3 + $0x88] sm:$0xf]  ;;  %v2074_v32 = vld [vmem:[#allocation3 + $0x94] sm:$0xf0]  ;;  %v2072_v55 = vld [vmem:[#allocation3 + $0x8c] sm:$0xf] }
 0x240   :  { %v631_v52 = vunpack.c.l.b16 %v589_v42  ;;  %1043 = vmatpush.bf16.msrb.mxu1 %v2646_v47  ;;  %v2665_v7 = vor.u32 %v2061_v57, %v1875_v56  ;;  %v2675_v16 = vor.u32 %v2082_v2, %v1963_v1  ;;  %v2677_v8 = vor.u32 %v2080_v3, %v1965_v5  ;;  %v1933_v33 = vld [vmem:[#allocation3 + $0x98] sm:$0xf0]  ;;  %v1915_v38 = vld [vmem:[#allocation3 + $0x68] sm:$0xf]  ;;  %v2070_v40 = vld [vmem:[#allocation3 + $0x74] sm:$0xf0] }
 0x241   :  { %v636_v53 = vsel %vm382_vm12, %v629_v43, %v635_v58  ;;  %v2681_v23 = vor.u32 %v2059_v9, %v1877_v10  ;;  %v2683_v25 = vor.u32 %v2057_v13, %v1859_v12  ;;  %v2688_v28 = vor.u32 %v2078_v19, %v1947_v18  ;;  %v2068_v41 = vld [vmem:[#allocation3 + $0x6c] sm:$0xf]  ;;  %v1917_v42 = vld [vmem:[#allocation3 + $0x78] sm:$0xf0]  ;;  %v2066_v58 = vld [vmem:[#allocation3 + $0x54] sm:$0xf0] }
 0x242   :  { %v637_v59 = vsel %vm384_vm11, %v630_v44, %v636_v53  ;;  %1031 = vmatpush.bf16.msrb.mxu0 %v2650_v50  ;;  %v2690_v30 = vor.u32 %v2076_v21, %v1949_v22  ;;  %v2694_v34 = vor.u32 %v2055_v26, %v1861_v27  ;;  %v2699_v35 = vor.u32 %v2074_v32, %v1931_v31  ;;  %v1899_v44 = vld [vmem:[#allocation3 + $0x48] sm:$0xf]  ;;  %v2064_v46 = vld [vmem:[#allocation3 + $0x4c] sm:$0xf]  ;;  %v1901_v48 = vld [vmem:[#allocation3 + $0x58] sm:$0xf0] }
 0x243   :  { %v638_v61 = vsel %vm386_vm13, %v631_v52, %v637_v59  ;;  %v2701_v37 = vor.u32 %v2072_v55, %v1933_v33  ;;  %v2709_v45 = vor.u32 %v2070_v40, %v1915_v38  ;;  %v2711_v43 = vor.u32 %v2068_v41, %v1917_v42  ;;  %v1883_v51 = vld [vmem:[#allocation3 + $0x28] sm:$0xf]  ;;  %v2062_v52 = vld [vmem:[#allocation3 + $0x34] sm:$0xf0]  ;;  %v2060_v53 = vld [vmem:[#allocation3 + $0x2c] sm:$0xf] }
 0x244   :  { %v2660_v4 = vpack.c.b16 %v638_v61, %v638_v61  ;;  %1044 = vmatpush.bf16.msrb.mxu1 %v2663_v6  ;;  %v2722_v15 = vor.u32 %v2066_v58, %v1899_v44  ;;  %v2724_v49 = vor.u32 %v2064_v46, %v1901_v48  ;;  %v1885_v54 = vld [vmem:[#allocation3 + $0x38] sm:$0xf0]  ;;  %v2730_v56 = vor.u32 %v2062_v52, %v1883_v51  ;;  %v1867_v59 = vld [vmem:[#allocation3 + $0x8] sm:$0xf]  ;;  %v2058_v61 = vld [vmem:[#allocation3 + $0x14] sm:$0xf0] }
 0x245   :  { %v2732_v57 = vor.u32 %v2060_v53, %v1885_v54  ;;  %v2056_v1 = vld [vmem:[#allocation3 + $0xc] sm:$0xf]  ;;  %v1869_v2 = vld [vmem:[#allocation3 + $0x18] sm:$0xf0]  ;;  %v2738_v3 = vor.u32 %v2058_v61, %v1867_v59  ;;  %v3195_v41 = vmov 0 }
 0x246   :  { %1853 = vmatmul.msk.bf16.vlgmr.msra.gmra.mxu2 %vm448_vm15, %v2660_v4  ;;  %1854 = vmatmul.msk.bf16.vlgmr.msra.gmra.mxu3 %vm448_vm15, %v2660_v4  ;;  %v787_v5 = vld [vmem:[%s3171_s8] sm:$0xf] }
 0x247   :  { %1052 = vmatpush.bf16.msra.mxu2 %v2656_v62  ;;  %1065 = vmatpush.bf16.msra.mxu3 %v2658_v0  ;;  %v2807_v9 = vld [vmem:[%s3169_s6] sm:$0xf]  ;;  %vm788_vm2 = vcmp.gt.f32.partialorder %v787_v5, 0.5 }
 0x248   :  { %1032 = vmatpush.bf16.msrb.mxu0 %v2665_v7  ;;  %1045 = vmatpush.bf16.msrb.mxu1 %v2681_v23  ;;  %v609_v10 = vperm.slane %v2807_v9, 1  ;;  %v2811_v12 = vsel %vm788_vm2, 1, %v2275_v14  ;;  %v608_v13 = vperm.slane %v2807_v9, 0  ;;  %v611_v42 = vperm.slane %v2807_v9, 3 }
 0x249   :  { %v822_v22 = vperm.slane %v2811_v12, 0  ;;  %v823_v26 = vperm.slane %v2811_v12, 1 }
 0x24b   :  { %1053 = vmatpush.bf16.msra.mxu2 %v2675_v16  ;;  %1066 = vmatpush.bf16.msra.mxu3 %v2677_v8  ;;  %vm2818_vm4 = vcmp.eq.s32.totalorder %v822_v22, 1  ;;  %vm2822_vm5 = vcmp.eq.s32.totalorder %v823_v26, 1 }
 0x24c   :  { %1033 = vmatpush.bf16.msrb.mxu0 %v2683_v25  ;;  %1046 = vmatpush.bf16.msrb.mxu1 %v2694_v34  ;;  %v3196_v41 = vsel %vm2822_vm5, 4294967295, %v3195_v41 }
 0x24d   :  { %3197 = vst [vmem:[#allocation9_spill] sm:$0xff] %v3196_v41 }
 0x24f   :  { %1054 = vmatpush.bf16.msra.mxu2 %v2688_v28  ;;  %1067 = vmatpush.bf16.msra.mxu3 %v2690_v30 }
 0x250   :  { %1182 = vmatpush.bf16.msra.mxu0 %v2548_v24  ;;  %1195 = vmatpush.bf16.msra.mxu1 %v2556_v29 }
 0x251   :  { %1034 = vmatmul.bf16.vlgmr.msrb.gmra.mxu0 %v2275_v14  ;;  %1047 = vmatmul.bf16.vlgmr.msrb.gmra.mxu1 %v2275_v14 }
 0x253   :  { %1055 = vmatpush.bf16.msra.mxu2 %v2699_v35  ;;  %1068 = vmatpush.bf16.msra.mxu3 %v2701_v37 }
 0x254   :  { %1183 = vmatpush.bf16.msra.mxu0 %v2582_v36  ;;  %1196 = vmatpush.bf16.msra.mxu1 %v2586_v60 }
 0x256   :  { %1855 = vmatmul.msk.bf16.vlgmr.msrb.gmra.mxu2 %vm448_vm15, %v2660_v4  ;;  %1856 = vmatmul.msk.bf16.vlgmr.msrb.gmra.mxu3 %vm448_vm15, %v2660_v4  ;;  %v2740_v4 = vor.u32 %v2056_v1, %v1869_v2 }
 0x257   :  { %1056 = vmatpush.bf16.msra.mxu2 %v2709_v45  ;;  %1069 = vmatpush.bf16.msra.mxu3 %v2711_v43 }
 0x258   :  { %1184 = vmatpush.bf16.msra.mxu0 %v2617_v63  ;;  %1197 = vmatpush.bf16.msra.mxu1 %v2627_v11 }
 0x25b   :  { %1057 = vmatpush.bf16.msra.mxu2 %v2722_v15  ;;  %1070 = vmatpush.bf16.msra.mxu3 %v2724_v49 }
 0x25c   :  { %1185 = vmatpush.bf16.msra.mxu0 %v2629_v17  ;;  %1198 = vmatpush.bf16.msra.mxu1 %v2638_v20 }
 0x25f   :  { %1058 = vmatpush.bf16.msra.mxu2 %v2730_v56  ;;  %1071 = vmatpush.bf16.msra.mxu3 %v2732_v57 }
 0x260   :  { %1186 = vmatpush.bf16.msra.mxu0 %v2642_v39  ;;  %1199 = vmatpush.bf16.msra.mxu1 %v2646_v47 }
 0x263   :  { %1059 = vmatpush.bf16.msra.mxu2 %v2738_v3  ;;  %1072 = vmatpush.bf16.msra.mxu3 %v2740_v4 }
 0x264   :  { %1187 = vmatpush.bf16.msra.mxu0 %v2650_v50  ;;  %1200 = vmatpush.bf16.msra.mxu1 %v2663_v6 }
 0x266   :  { %1060 = vmatmul.bf16.vlgmr.msra.gmra.mxu2 %v2275_v14  ;;  %1073 = vmatmul.bf16.vlgmr.msra.gmra.mxu3 %v2275_v14 }
 0x267   :  { %1208 = vmatpush.bf16.msrb.mxu2 %v2656_v62  ;;  %1221 = vmatpush.bf16.msrb.mxu3 %v2658_v0 }
 0x268   :  { %1188 = vmatpush.bf16.msra.mxu0 %v2665_v7  ;;  %1201 = vmatpush.bf16.msra.mxu1 %v2681_v23 }
 0x26b   :  { %1209 = vmatpush.bf16.msrb.mxu2 %v2675_v16  ;;  %1222 = vmatpush.bf16.msrb.mxu3 %v2677_v8 }
 0x26c   :  { %1189 = vmatpush.bf16.msra.mxu0 %v2683_v25  ;;  %1202 = vmatpush.bf16.msra.mxu1 %v2694_v34 }
 0x26f   :  { %1210 = vmatpush.bf16.msrb.mxu2 %v2688_v28  ;;  %1223 = vmatpush.bf16.msrb.mxu3 %v2690_v30 }
 0x270   :  { %1306 = vmatpush.bf16.msrb.mxu0 %v2548_v24  ;;  %1319 = vmatpush.bf16.msrb.mxu1 %v2556_v29 }
 0x273   :  { %1211 = vmatpush.bf16.msrb.mxu2 %v2699_v35  ;;  %1224 = vmatpush.bf16.msrb.mxu3 %v2701_v37 }
 0x274   :  { %1307 = vmatpush.bf16.msrb.mxu0 %v2582_v36  ;;  %1320 = vmatpush.bf16.msrb.mxu1 %v2586_v60 }
 0x277   :  { %1212 = vmatpush.bf16.msrb.mxu2 %v2709_v45  ;;  %1225 = vmatpush.bf16.msrb.mxu3 %v2711_v43 }
 0x278   :  { %1308 = vmatpush.bf16.msrb.mxu0 %v2617_v63  ;;  %1321 = vmatpush.bf16.msrb.mxu1 %v2627_v11 }
 0x27b   :  { %1213 = vmatpush.bf16.msrb.mxu2 %v2722_v15  ;;  %1226 = vmatpush.bf16.msrb.mxu3 %v2724_v49 }
 0x27c   :  { %1309 = vmatpush.bf16.msrb.mxu0 %v2629_v17  ;;  %1322 = vmatpush.bf16.msrb.mxu1 %v2638_v20 }
 0x27f   :  { %1214 = vmatpush.bf16.msrb.mxu2 %v2730_v56  ;;  %1227 = vmatpush.bf16.msrb.mxu3 %v2732_v57 }
 0x280   :  { %1310 = vmatpush.bf16.msrb.mxu0 %v2642_v39  ;;  %1323 = vmatpush.bf16.msrb.mxu1 %v2646_v47 }
 0x283   :  { %1215 = vmatpush.bf16.msrb.mxu2 %v2738_v3  ;;  %1228 = vmatpush.bf16.msrb.mxu3 %v2740_v4 }
 0x284   :  { %1311 = vmatpush.bf16.msrb.mxu0 %v2650_v50  ;;  %1324 = vmatpush.bf16.msrb.mxu1 %v2663_v6 }
 0x287   :  { %1332 = vmatpush.bf16.msra.mxu2 %v2656_v62  ;;  %1345 = vmatpush.bf16.msra.mxu3 %v2658_v0 }
 0x288   :  { %1312 = vmatpush.bf16.msrb.mxu0 %v2665_v7  ;;  %1325 = vmatpush.bf16.msrb.mxu1 %v2681_v23 }
 0x28b   :  { %1333 = vmatpush.bf16.msra.mxu2 %v2675_v16  ;;  %1346 = vmatpush.bf16.msra.mxu3 %v2677_v8 }
 0x28c   :  { %1313 = vmatpush.bf16.msrb.mxu0 %v2683_v25  ;;  %1326 = vmatpush.bf16.msrb.mxu1 %v2694_v34 }
 0x28f   :  { %1334 = vmatpush.bf16.msra.mxu2 %v2688_v28  ;;  %1347 = vmatpush.bf16.msra.mxu3 %v2690_v30 }
 0x293   :  { %1335 = vmatpush.bf16.msra.mxu2 %v2699_v35  ;;  %1348 = vmatpush.bf16.msra.mxu3 %v2701_v37 }
 0x297   :  { %1336 = vmatpush.bf16.msra.mxu2 %v2709_v45  ;;  %1349 = vmatpush.bf16.msra.mxu3 %v2711_v43 }
 0x29b   :  { %1337 = vmatpush.bf16.msra.mxu2 %v2722_v15  ;;  %1350 = vmatpush.bf16.msra.mxu3 %v2724_v49 }
 0x29f   :  { %1338 = vmatpush.bf16.msra.mxu2 %v2730_v56  ;;  %1351 = vmatpush.bf16.msra.mxu3 %v2732_v57 }
 0x2a3   :  { %1339 = vmatpush.bf16.msra.mxu2 %v2738_v3  ;;  %1352 = vmatpush.bf16.msra.mxu3 %v2740_v4 }
 0x2c9   :  { %v732_v18 = vpop.f32.mrf.mxu2  ;;  %v745_v19 = vpop.f32.mrf.mxu3 }
 0x2ca   :  { %v746_v21 = vadd.f32 %v745_v19, %v609_v10  ;;  %v733_v27 = vadd.f32 %v732_v18, %v608_v13 }
 0x2cc   :  { %v779_v31 = vrot.slane %v746_v21, 4 }
 0x2ce   :  { %v1035_v32 = vpop.f32.mrf.mxu0  ;;  %v781_v55 = vsel %vm181_vm1, %v733_v27, %v779_v31  ;;  %v783_v33 = vsel %vm181_vm1, %v779_v31, %v733_v27  ;;  %v1048_v1 = vpop.f32.mrf.mxu1 }
 0x2cf   :  { %v784_v14 = vrot.slane %v783_v33, 4  ;;  %v830_v40 = vperm.slane %v781_v55, 0  ;;  %v846_v44 = vperm.slane %v781_v55, 3  ;;  %v831_v58 = vperm.slane %v781_v55, 4 }
 0x2d0   :  { %v847_v46 = vperm.slane %v781_v55, 7  ;;  %v1145_v48 = vperm.slane %v781_v55, 1  ;;  %v1161_v5 = vperm.slane %v781_v55, 2  ;;  %v1146_v13 = vperm.slane %v781_v55, 5 }
 0x2d1   :  { %v734_v51 = vpop.f32.mrf.mxu2  ;;  %v747_v52 = vpop.f32.mrf.mxu3  ;;  %v834_v53 = vperm.slane %v784_v14, 0  ;;  %v850_v54 = vperm.slane %v784_v14, 3  ;;  %v835_v59 = vperm.slane %v784_v14, 4  ;;  %v851_v61 = vperm.slane %v784_v14, 7 }
 0x2d2   :  { %v1149_v2 = vperm.slane %v784_v14, 1  ;;  %v1165_v10 = vperm.slane %v784_v14, 2  ;;  %v1150_v51 = vperm.slane %v784_v14, 5  ;;  %v1162_v52 = vperm.slane %v781_v55, 6 }
 0x2d3   :  { %v2828_v18 = vsel %vm400_vm8, %v834_v53, %v830_v40  ;;  %v2831_v19 = vsel %vm400_vm8, %v850_v54, %v846_v44  ;;  %v2834_v21 = vsel %vm400_vm8, %v835_v59, %v831_v58  ;;  %v2837_v22 = vsel %vm400_vm8, %v851_v61, %v847_v46 }
 0x2d4   :  { %3198 = vst [vmem:[#allocation10_spill] sm:$0xff] %v2828_v18  ;;  %v862_v26 = vsel %vm2818_vm4, %v2828_v18, %v2831_v19  ;;  %v863_v27 = vsel %vm2822_vm5, %v2834_v21, %v2837_v22  ;;  %v2848_v31 = vsel %vm400_vm8, %v1149_v2, %v1145_v48  ;;  %v2851_v33 = vsel %vm400_vm8, %v1165_v10, %v1161_v5 }
 0x2d5   :  { %3199 = vst [vmem:[#allocation11_spill] sm:$0xff] %v2831_v19  ;;  %v1078_v40 = vadd.f32 %v1035_v32, %v862_v26  ;;  %v1079_v44 = vadd.f32 %v1048_v1, %v863_v27  ;;  %v1166_v53 = vperm.slane %v784_v14, 6  ;;  %v2866_v61 = vsel %vm400_vm8, %v1150_v51, %v1146_v13 }
 0x2d6   :  { %3200 = vst [vmem:[#allocation12_spill] sm:$0xff] %v2834_v21  ;;  %v1037_v58 = vpop.f32.mrf.mxu0  ;;  %v610_v14 = vperm.slane %v2807_v9, 2  ;;  %v1050_v27 = vpop.f32.mrf.mxu1  ;;  %v824_v55 = vperm.slane %v2811_v12, 2  ;;  %v825_v32 = vperm.slane %v2811_v12, 3 }
 0x2d7   :  { %3201 = vst [vmem:[#allocation13_spill] sm:$0xff] %v2837_v22  ;;  %v1985_v54 = vmul.f32 -1.442695, %v1078_v40  ;;  %v1986_v59 = vmul.f32 -1.442695, %v1079_v44  ;;  %v2874_v1 = vsel %vm400_vm8, %v1166_v53, %v1162_v52 }
 0x2d8   :  { %3202 = vst [vmem:[#allocation14_spill] sm:$0xff] %v2866_v61  ;;  %vm2894_vm6 = vcmp.eq.s32.totalorder %v824_v55, 1 }
 0x2d9   :  { %3203 = vst [vmem:[#allocation15_spill] sm:$0xff] %v2874_v1  ;;  %2142 = vpow2.f32 %v1985_v54  ;;  %v758_v2 = vpop.f32.mrf.mxu2  ;;  %v771_v5 = vpop.f32.mrf.mxu3 }
 0x2da   :  { %2144 = vpow2.f32 %v1986_v59  ;;  %v772_v26 = vadd.f32 %v771_v5, %v611_v42  ;;  %v759_v9 = vadd.f32 %v758_v2, %v610_v14 }
 0x2dc   :  { %v780_v40 = vrot.slane %v772_v26, 4 }
 0x2de   :  { %v785_v44 = vsel %vm181_vm1, %v780_v40, %v759_v9  ;;  %v782_v54 = vsel %vm181_vm1, %v759_v9, %v780_v40  ;;  %vm2898_vm1 = vcmp.eq.s32.totalorder %v825_v32, 1 }
 0x2df   :  { %v2143_v58 = vpop.eup %2142  ;;  %v786_v51 = vrot.slane %v785_v44, 4  ;;  %v832_v26 = vperm.slane %v782_v54, 0  ;;  %v848_v27 = vperm.slane %v782_v54, 3  ;;  %v833_v12 = vperm.slane %v782_v54, 4 }
 0x2e0   :  { %v2145_v52 = vpop.eup %2144  ;;  %v2885_v53 = vadd.f32 1.0, %v2143_v58  ;;  %v849_v40 = vperm.slane %v782_v54, 7  ;;  %v1163_v10 = vperm.slane %v782_v54, 2  ;;  %v1148_v21 = vperm.slane %v782_v54, 5 }
 0x2e1   :  { %v2890_v48 = vadd.f32 1.0, %v2145_v52  ;;  %v760_v59 = vpop.f32.mrf.mxu2  ;;  %v773_v42 = vpop.f32.mrf.mxu3  ;;  %v836_v5 = vperm.slane %v786_v51, 0  ;;  %v852_v14 = vperm.slane %v786_v51, 3  ;;  %v837_v2 = vperm.slane %v786_v51, 4 }
 0x2e2   :  { %2146 = vrcp.f32 %v2885_v53  ;;  %v853_v59 = vperm.slane %v786_v51, 7  ;;  %v1147_v42 = vperm.slane %v782_v54, 1  ;;  %v1151_v55 = vperm.slane %v786_v51, 1 }
 0x2e3   :  { %2148 = vrcp.f32 %v2890_v48  ;;  %v2903_v58 = vsel %vm400_vm8, %v836_v5, %v832_v26  ;;  %v2906_v52 = vsel %vm400_vm8, %v852_v14, %v848_v27  ;;  %v2909_v13 = vsel %vm400_vm8, %v837_v2, %v833_v12 }
 0x2e4   :  { %3208 = vst [vmem:[#allocation16_spill] sm:$0xff] %v2903_v58  ;;  %v1167_v46 = vperm.slane %v786_v51, 2  ;;  %v2912_v32 = vsel %vm400_vm8, %v853_v59, %v849_v40  ;;  %v1152_v22 = vperm.slane %v786_v51, 5  ;;  %v1168_v18 = vperm.slane %v786_v51, 6 }
 0x2e5   :  { %3209 = vst [vmem:[#allocation17_spill] sm:$0xff] %v2906_v52  ;;  %v2915_v5 = vsel %vm400_vm8, %v1151_v55, %v1147_v42  ;;  %v1164_v26 = vperm.slane %v782_v54, 6  ;;  %v865_v51 = vsel %vm2898_vm1, %v2909_v13, %v2912_v32  ;;  %v864_v42 = vsel %vm2894_vm6, %v2903_v58, %v2906_v52 }
 0x2e6   :  { %3210 = vst [vmem:[#allocation18_spill] sm:$0xff] %v2909_v13  ;;  %v2918_v14 = vsel %vm400_vm8, %v1167_v46, %v1163_v10  ;;  %v2934_v10 = vsel %vm400_vm8, %v1152_v22, %v1148_v21  ;;  %vm1110_vm10 = vweird.f32 %v2890_v48 }
 0x2e7   :  { %3211 = vst [vmem:[#allocation19_spill] sm:$0xff] %v2912_v32  ;;  %v2942_v1 = vsel %vm400_vm8, %v1168_v18, %v1164_v26  ;;  %vm1091_vm8 = vweird.f32 %v2885_v53 }
 0x2e8   :  { %v2147_v19 = vpop.eup %2146  ;;  %3212 = vst [vmem:[#allocation20_spill] sm:$0xff] %v2918_v14 }
 0x2e9   :  { %v2149_v27 = vpop.eup %2148  ;;  %v1087_v12 = vmul.f32 %v2147_v19, %v2885_v53  ;;  %v1061_v40 = vpop.f32.mrf.mxu2  ;;  %vm1092_vm7 = vweird.f32 %v2147_v19 }
 0x2ea   :  { %v1074_v59 = vpop.f32.mrf.mxu3  ;;  %v1106_v54 = vmul.f32 %v2149_v27, %v2890_v48  ;;  %v1080_v61 = vadd.f32 %v1061_v40, %v864_v42  ;;  %vm1111_vm9 = vweird.f32 %v2149_v27  ;;  %v1116_v40 = vand.u32 2147483648, %v2890_v48  ;;  %vm2964_vm11 = vmor %vm1091_vm8, %vm1092_vm7 }
 0x2eb   :  { %v1081_v55 = vadd.f32 %v1074_v59, %v865_v51  ;;  %v1088_v2 = vsub.f32 1.0, %v1087_v12  ;;  %vm1112_vm12 = vmor %vm1110_vm10, %vm1111_vm9 }
 0x2ec   :  { %v1107_v22 = vsub.f32 1.0, %v1106_v54  ;;  %v1097_v54 = vand.u32 2147483648, %v2885_v53  ;;  %v3236_v9 = vld [vmem:[#allocation17_spill] sm:$0xff] }
 0x2ed   :  { %v1987_v41 = vmul.f32 -1.442695, %v1081_v55  ;;  %v1089_v18 = vmul.f32 %v2147_v19, %v1088_v2  ;;  %v1095_v55 = vand.u32 2147483647, %v2885_v53  ;;  %v3234_v38 = vld [vmem:[#allocation18_spill] sm:$0xff] }
 0x2ee   :  { %v1108_v51 = vmul.f32 %v2149_v27, %v1107_v22 }
 0x2ef   :  { %2150 = vpow2.f32 %v1987_v41  ;;  %v1090_v59 = vadd.f32 %v2147_v19, %v1089_v18  ;;  %v1114_v41 = vand.u32 2147483647, %v2890_v48  ;;  %vm1096_vm13 = vcmp.eq.f32.partialorder %v1095_v55, 8.507059e+37 }
 0x2f0   :  { %v1109_v42 = vadd.f32 %v2149_v27, %v1108_v51  ;;  %2152 = vtanh.f32 %v1080_v61  ;;  %v1117_v51 = vor.u32 1.1754944e-38, %v1116_v40  ;;  %v1098_v61 = vor.u32 1.1754944e-38, %v1097_v54 }
 0x2f1   :  { %v1063_v18 = vpop.f32.mrf.mxu2  ;;  %v1094_v21 = vsel %vm2964_vm11, %v2147_v19, %v1090_v59  ;;  %vm1115_vm14 = vcmp.eq.f32.partialorder %v1114_v41, 8.507059e+37 }
 0x2f2   :  { %v1076_v22 = vpop.f32.mrf.mxu3  ;;  %v1113_v46 = vsel %vm1112_vm12, %v2149_v27, %v1109_v42  ;;  %v1099_v52 = vsel %vm1096_vm13, %v1098_v61, %v1094_v21 }
 0x2f3   :  { %v1118_v13 = vsel %vm1115_vm14, %v1117_v51, %v1113_v46 }
 0x2f4   :  { %v1140_v53 = vmul.f32 0.0, %v1118_v13 }
 0x2f5   :  { %v2151_v26 = vpop.eup %2150 }
 0x2f6   :  { %v1124_v12 = vadd.f32 1.0, %v2151_v26  ;;  %v2153_v58 = vpop.eup %2152 }
 0x2f7   :  { %v1141_v32 = vmul.f32 %v2153_v58, %v1099_v52 }
 0x2f8   :  { %2154 = vrcp.f32 %v1124_v12  ;;  %v1136_v19 = vand.u32 2147483648, %v1124_v12  ;;  %v1134_v59 = vand.u32 2147483647, %v1124_v12  ;;  %vm1130_vm3 = vweird.f32 %v1124_v12 }
 0x2f9   :  { %v2972_v22 = vadd.f32 %v1141_v32, %v1140_v53 }
 0x2fa   :  { %v1137_v26 = vor.u32 1.1754944e-38, %v1136_v19  ;;  %vm1135_vm7 = vcmp.eq.f32.partialorder %v1134_v59, 8.507059e+37 }
 0x2fb   :  { %2156 = vtanh.f32 %v2972_v22 }
 0x2fe   :  { %v2155_v48 = vpop.eup %2154 }
 0x2ff   :  { %v1126_v18 = vmul.f32 %v2155_v48, %v1124_v12  ;;  %vm1131_vm0 = vweird.f32 %v2155_v48 }
 0x300   :  { %vm1132_vm2 = vmor %vm1130_vm3, %vm1131_vm0 }
 0x301   :  { %v1127_v14 = vsub.f32 1.0, %v1126_v18  ;;  %v2157_v46 = vpop.eup %2156 }
 0x303   :  { %v1128_v27 = vmul.f32 %v2155_v48, %v1127_v14 }
 0x305   :  { %v1129_v40 = vadd.f32 %v2155_v48, %v1128_v27 }
 0x307   :  { %v1133_v21 = vsel %vm1132_vm2, %v2155_v48, %v1129_v40 }
 0x308   :  { %v1138_v13 = vsel %vm1135_vm7, %v1137_v26, %v1133_v21 }
 0x309   :  { %v2975_v58 = vmul.f32 %v2157_v46, %v1138_v13 }
 0x30b   :  { %v1181_v52 = vpack.c.bf16 %v2975_v58, %v2975_v58 }
 0x30d   :  { %1190 = vmatmul.bf16.vlgmr.msra.gmra.mxu0 %v1181_v52  ;;  %1203 = vmatmul.bf16.vlgmr.msra.gmra.mxu1 %v1181_v52 }
 0x30e   :  { %1216 = vmatmul.bf16.vlgmr.msrb.gmra.mxu2 %v1181_v52  ;;  %1229 = vmatmul.bf16.vlgmr.msrb.gmra.mxu3 %v1181_v52 }
 0x30f   :  { %1430 = vmatpush.bf16.msra.mxu0 %v2548_v24  ;;  %1443 = vmatpush.bf16.msra.mxu1 %v2556_v29 }
 0x310   :  { %1456 = vmatpush.bf16.msrb.mxu2 %v2656_v62  ;;  %1469 = vmatpush.bf16.msrb.mxu3 %v2658_v0 }
 0x313   :  { %1431 = vmatpush.bf16.msra.mxu0 %v2582_v36  ;;  %1444 = vmatpush.bf16.msra.mxu1 %v2586_v60  ;;  %v3215_v36 = vsel %vm2818_vm4, %v2848_v31, %v2851_v33 }
 0x314   :  { %1457 = vmatpush.bf16.msrb.mxu2 %v2675_v16  ;;  %1470 = vmatpush.bf16.msrb.mxu3 %v2677_v8 }
 0x317   :  { %1432 = vmatpush.bf16.msra.mxu0 %v2617_v63  ;;  %1445 = vmatpush.bf16.msra.mxu1 %v2627_v11  ;;  %v3217_v11 = vld [vmem:[#allocation14_spill] sm:$0xff] }
 0x318   :  { %1458 = vmatpush.bf16.msrb.mxu2 %v2688_v28  ;;  %1471 = vmatpush.bf16.msrb.mxu3 %v2690_v30 }
 0x31b   :  { %1433 = vmatpush.bf16.msra.mxu0 %v2629_v17  ;;  %1446 = vmatpush.bf16.msra.mxu1 %v2638_v20  ;;  %v3218_v17 = vld [vmem:[#allocation15_spill] sm:$0xff] }
 0x31c   :  { %1459 = vmatpush.bf16.msrb.mxu2 %v2699_v35  ;;  %1472 = vmatpush.bf16.msrb.mxu3 %v2701_v37  ;;  %v3219_v20 = vsel %vm2822_vm5, %v3217_v11, %v3218_v17 }
 0x31f   :  { %1434 = vmatpush.bf16.msra.mxu0 %v2642_v39  ;;  %1447 = vmatpush.bf16.msra.mxu1 %v2646_v47 }
 0x320   :  { %1460 = vmatpush.bf16.msrb.mxu2 %v2709_v45  ;;  %1473 = vmatpush.bf16.msrb.mxu3 %v2711_v43 }
 0x323   :  { %1435 = vmatpush.bf16.msra.mxu0 %v2650_v50  ;;  %1448 = vmatpush.bf16.msra.mxu1 %v2663_v6  ;;  %v3220_v6 = vsel %vm2898_vm1, %v2934_v10, %v2942_v1 }
 0x324   :  { %1461 = vmatpush.bf16.msrb.mxu2 %v2722_v15  ;;  %1474 = vmatpush.bf16.msrb.mxu3 %v2724_v49  ;;  %v3221_v49 = vld [vmem:[#allocation20_spill] sm:$0xff] }
 0x327   :  { %1436 = vmatpush.bf16.msra.mxu0 %v2665_v7  ;;  %1449 = vmatpush.bf16.msra.mxu1 %v2681_v23 }
 0x328   :  { %1462 = vmatpush.bf16.msrb.mxu2 %v2730_v56  ;;  %1475 = vmatpush.bf16.msrb.mxu3 %v2732_v57  ;;  %v3222_v56 = vsel %vm2894_vm6, %v2915_v5, %v3221_v49 }
 0x32b   :  { %1437 = vmatpush.bf16.msra.mxu0 %v2683_v25  ;;  %1450 = vmatpush.bf16.msra.mxu1 %v2694_v34 }
 0x32c   :  { %1463 = vmatpush.bf16.msrb.mxu2 %v2738_v3  ;;  %1476 = vmatpush.bf16.msrb.mxu3 %v2740_v4 }
 0x38a   :  { %v1191_v24 = vpop.f32.mrf.mxu0  ;;  %v1204_v29 = vpop.f32.mrf.mxu1 }
 0x38b   :  { %v1234_v60 = vadd.f32 %v1191_v24, %v3215_v36  ;;  %v1235_v39 = vadd.f32 %v1204_v29, %v3219_v20 }
 0x38d   :  { %v1988_v47 = vmul.f32 -1.442695, %v1234_v60  ;;  %v1989_v50 = vmul.f32 -1.442695, %v1235_v39 }
 0x38f   :  { %2158 = vpow2.f32 %v1988_v47 }
 0x390   :  { %2160 = vpow2.f32 %v1989_v50 }
 0x391   :  { %v1217_v62 = vpop.f32.mrf.mxu2  ;;  %v1230_v0 = vpop.f32.mrf.mxu3 }
 0x392   :  { %v1237_v7 = vadd.f32 %v1230_v0, %v3220_v6  ;;  %v1193_v16 = vpop.f32.mrf.mxu0  ;;  %v1206_v8 = vpop.f32.mrf.mxu1  ;;  %v1236_v57 = vadd.f32 %v1217_v62, %v3222_v56 }
 0x393   :  { %v3223_v8 = vsel %vm2818_vm4, %v2851_v33, %v2848_v31 }
 0x394   :  { %v1990_v23 = vmul.f32 -1.442695, %v1237_v7 }
 0x395   :  { %v2159_v25 = vpop.eup %2158 }
 0x396   :  { %v2161_v28 = vpop.eup %2160  ;;  %v1241_v30 = vadd.f32 1.0, %v2159_v25  ;;  %2162 = vpow2.f32 %v1990_v23  ;;  %v3224_v25 = vsel %vm2822_vm5, %v3218_v17, %v3217_v11 }
 0x397   :  { %v1260_v34 = vadd.f32 1.0, %v2161_v28 }
 0x398   :  { %2164 = vrcp.f32 %v1241_v30  ;;  %v1253_v54 = vand.u32 2147483648, %v1241_v30  ;;  %v1251_v55 = vand.u32 2147483647, %v1241_v30  ;;  %vm1247_vm10 = vweird.f32 %v1241_v30 }
 0x399   :  { %2166 = vrcp.f32 %v1260_v34  ;;  %v1219_v35 = vpop.f32.mrf.mxu2  ;;  %v1232_v37 = vpop.f32.mrf.mxu3  ;;  %v1272_v42 = vand.u32 2147483648, %v1260_v34  ;;  %v1270_v51 = vand.u32 2147483647, %v1260_v34  ;;  %vm1266_vm11 = vweird.f32 %v1260_v34 }
 0x39a   :  { %v1254_v48 = vor.u32 1.1754944e-38, %v1253_v54  ;;  %vm1252_vm14 = vcmp.eq.f32.partialorder %v1251_v55, 8.507059e+37 }
 0x39b   :  { %v1273_v27 = vor.u32 1.1754944e-38, %v1272_v42  ;;  %vm1271_vm0 = vcmp.eq.f32.partialorder %v1270_v51, 8.507059e+37 }
 0x39c   :  { %v2163_v45 = vpop.eup %2162 }
 0x39d   :  { %v1280_v43 = vadd.f32 1.0, %v2163_v45  ;;  %v3225_v45 = vsel %vm2898_vm1, %v2942_v1, %v2934_v10  ;;  %v3226_v1 = vsel %vm2894_vm6, %v3221_v49, %v2915_v5 }
 0x39e   :  { %v2165_v15 = vpop.eup %2164 }
 0x39f   :  { %v2167_v3 = vpop.eup %2166  ;;  %v1243_v4 = vmul.f32 %v2165_v15, %v1241_v30  ;;  %2168 = vrcp.f32 %v1280_v43  ;;  %vm1248_vm8 = vweird.f32 %v2165_v15  ;;  %v1292_v20 = vand.u32 2147483648, %v1280_v43 }
 0x3a0   :  { %v1262_v32 = vmul.f32 %v2167_v3, %v1260_v34  ;;  %2170 = vtanh.f32 %v1236_v57  ;;  %vm1267_vm9 = vweird.f32 %v2167_v3  ;;  %vm1249_vm12 = vmor %vm1247_vm10, %vm1248_vm8  ;;  %vm1286_vm2 = vweird.f32 %v1280_v43 }
 0x3a1   :  { %v1244_v14 = vsub.f32 1.0, %v1243_v4  ;;  %vm1268_vm13 = vmor %vm1266_vm11, %vm1267_vm9  ;;  %v1290_v39 = vand.u32 2147483647, %v1280_v43  ;;  %v1293_v50 = vor.u32 1.1754944e-38, %v1292_v20 }
 0x3a2   :  { %v1263_v12 = vsub.f32 1.0, %v1262_v32 }
 0x3a3   :  { %v1245_v2 = vmul.f32 %v2165_v15, %v1244_v14  ;;  %vm1291_vm8 = vcmp.eq.f32.partialorder %v1290_v39, 8.507059e+37 }
 0x3a4   :  { %v1264_v41 = vmul.f32 %v2167_v3, %v1263_v12 }
 0x3a5   :  { %v2169_v61 = vpop.eup %2168  ;;  %v1246_v53 = vadd.f32 %v2165_v15, %v1245_v2 }
 0x3a6   :  { %v1265_v18 = vadd.f32 %v2167_v3, %v1264_v41  ;;  %v1282_v19 = vmul.f32 %v2169_v61, %v1280_v43  ;;  %v2171_v40 = vpop.eup %2170  ;;  %vm1287_vm3 = vweird.f32 %v2169_v61 }
 0x3a7   :  { %v1250_v59 = vsel %vm1249_vm12, %v2165_v15, %v1246_v53  ;;  %vm1288_vm7 = vmor %vm1286_vm2, %vm1287_vm3 }
 0x3a8   :  { %v1255_v26 = vsel %vm1252_vm14, %v1254_v48, %v1250_v59  ;;  %v1269_v21 = vsel %vm1268_vm13, %v2167_v3, %v1265_v18  ;;  %v1283_v46 = vsub.f32 1.0, %v1282_v19 }
 0x3a9   :  { %v1274_v13 = vsel %vm1271_vm0, %v1273_v27, %v1269_v21  ;;  %v1297_v52 = vmul.f32 %v2171_v40, %v1255_v26 }
 0x3aa   :  { %v1296_v24 = vmul.f32 %v1274_v13, %v2972_v22  ;;  %v1284_v29 = vmul.f32 %v2169_v61, %v1283_v46 }
 0x3ac   :  { %v3032_v36 = vadd.f32 %v1297_v52, %v1296_v24  ;;  %v1285_v60 = vadd.f32 %v2169_v61, %v1284_v29 }
 0x3ae   :  { %2172 = vtanh.f32 %v3032_v36  ;;  %v1289_v47 = vsel %vm1288_vm7, %v2169_v61, %v1285_v60 }
 0x3af   :  { %v1294_v0 = vsel %vm1291_vm8, %v1293_v50, %v1289_v47 }
 0x3b4   :  { %v2173_v62 = vpop.eup %2172 }
 0x3b5   :  { %v3035_v6 = vmul.f32 %v2173_v62, %v1294_v0 }
 0x3b7   :  { %v1305_v22 = vpack.c.bf16 %v3035_v6, %v3035_v6 }
 0x3b9   :  { %1314 = vmatmul.bf16.vlgmr.msrb.gmra.mxu0 %v1305_v22  ;;  %1327 = vmatmul.bf16.vlgmr.msrb.gmra.mxu1 %v1305_v22 }
 0x3ba   :  { %1340 = vmatmul.bf16.vlgmr.msra.gmra.mxu2 %v1305_v22  ;;  %1353 = vmatmul.bf16.vlgmr.msra.gmra.mxu3 %v1305_v22 }
 0x436   :  { %v1315_v7 = vpop.f32.mrf.mxu0  ;;  %v1328_v16 = vpop.f32.mrf.mxu1 }
 0x437   :  { %v1358_v23 = vadd.f32 %v1315_v7, %v3223_v8  ;;  %v1359_v28 = vadd.f32 %v1328_v16, %v3224_v25 }
 0x439   :  { %v1991_v30 = vmul.f32 -1.442695, %v1358_v23  ;;  %v1992_v34 = vmul.f32 -1.442695, %v1359_v28 }
 0x43b   :  { %2174 = vpow2.f32 %v1991_v30 }
 0x43c   :  { %2176 = vpow2.f32 %v1992_v34 }
 0x43d   :  { %v1341_v35 = vpop.f32.mrf.mxu2  ;;  %v1354_v37 = vpop.f32.mrf.mxu3 }
 0x43e   :  { %v1361_v43 = vadd.f32 %v1354_v37, %v3225_v45  ;;  %v1317_v31 = vpop.f32.mrf.mxu0  ;;  %v1330_v33 = vpop.f32.mrf.mxu1  ;;  %v1360_v10 = vadd.f32 %v1341_v35, %v3226_v1  ;;  %v3233_v1 = vld [vmem:[#allocation19_spill] sm:$0xff] }
 0x43f   :  { %v3228_v33 = vld [vmem:[#allocation10_spill] sm:$0xff] }
 0x440   :  { %v1993_v15 = vmul.f32 -1.442695, %v1361_v43 }
 0x441   :  { %v2175_v56 = vpop.eup %2174 }
 0x442   :  { %v2177_v57 = vpop.eup %2176  ;;  %v1365_v3 = vadd.f32 1.0, %v2175_v56  ;;  %2178 = vpow2.f32 %v1993_v15 }
 0x443   :  { %v1384_v11 = vadd.f32 1.0, %v2177_v57  ;;  %v3230_v57 = vld [vmem:[#allocation13_spill] sm:$0xff] }
 0x444   :  { %2180 = vrcp.f32 %v1365_v3  ;;  %v1377_v51 = vand.u32 2147483648, %v1365_v3  ;;  %v1375_v48 = vand.u32 2147483647, %v1365_v3  ;;  %vm1371_vm11 = vweird.f32 %v1365_v3 }
 0x445   :  { %2182 = vrcp.f32 %v1384_v11  ;;  %v1343_v17 = vpop.f32.mrf.mxu2  ;;  %v1356_v4 = vpop.f32.mrf.mxu3  ;;  %v1396_v61 = vand.u32 2147483648, %v1384_v11  ;;  %v1394_v19 = vand.u32 2147483647, %v1384_v11  ;;  %vm1390_vm12 = vweird.f32 %v1384_v11 }
 0x446   :  { %v1378_v5 = vor.u32 1.1754944e-38, %v1377_v51  ;;  %vm1376_vm0 = vcmp.eq.f32.partialorder %v1375_v48, 8.507059e+37 }
 0x447   :  { %v1397_v26 = vor.u32 1.1754944e-38, %v1396_v61  ;;  %vm1395_vm3 = vcmp.eq.f32.partialorder %v1394_v19, 8.507059e+37 }
 0x448   :  { %v2179_v32 = vpop.eup %2178 }
 0x449   :  { %v1404_v14 = vadd.f32 1.0, %v2179_v32 }
 0x44a   :  { %v2181_v12 = vpop.eup %2180 }
 0x44b   :  { %v2183_v54 = vpop.eup %2182  ;;  %v1367_v42 = vmul.f32 %v2181_v12, %v1365_v3  ;;  %2184 = vrcp.f32 %v1404_v14  ;;  %vm1372_vm9 = vweird.f32 %v2181_v12  ;;  %v1416_v62 = vand.u32 2147483648, %v1404_v14  ;;  %v3231_v3 = vld [vmem:[#allocation12_spill] sm:$0xff] }
 0x44c   :  { %v1386_v2 = vmul.f32 %v2183_v54, %v1384_v11  ;;  %2186 = vtanh.f32 %v1360_v10  ;;  %vm1391_vm10 = vweird.f32 %v2183_v54  ;;  %vm1373_vm13 = vmor %vm1371_vm11, %vm1372_vm9  ;;  %vm1410_vm7 = vweird.f32 %v1404_v14 }
 0x44d   :  { %v1368_v55 = vsub.f32 1.0, %v1367_v42  ;;  %vm1392_vm14 = vmor %vm1390_vm12, %vm1391_vm10  ;;  %v1414_v0 = vand.u32 2147483647, %v1404_v14  ;;  %v1417_v7 = vor.u32 1.1754944e-38, %v1416_v62  ;;  %vm1561_vm10 = vcmask 1041408  }
 0x44e   :  { %v1387_v41 = vsub.f32 1.0, %v1386_v2  ;;  %v3232_v11 = vsel %vm2822_vm5, %v3230_v57, %v3231_v3  ;;  %v3235_v10 = vsel %vm2898_vm1, %v3233_v1, %v3234_v38 }
 0x44f   :  { %v1369_v53 = vmul.f32 %v2181_v12, %v1368_v55  ;;  %vm1415_vm9 = vcmp.eq.f32.partialorder %v1414_v0, 8.507059e+37 }
 0x450   :  { %v1388_v18 = vmul.f32 %v2183_v54, %v1387_v41 }
 0x451   :  { %v2185_v27 = vpop.eup %2184  ;;  %v1370_v59 = vadd.f32 %v2181_v12, %v1369_v53 }
 0x452   :  { %v1389_v49 = vadd.f32 %v2183_v54, %v1388_v18  ;;  %v1406_v40 = vmul.f32 %v2185_v27, %v1404_v14  ;;  %v2187_v46 = vpop.eup %2186  ;;  %vm1411_vm2 = vweird.f32 %v2185_v27 }
 0x453   :  { %v1374_v21 = vsel %vm1373_vm13, %v2181_v12, %v1370_v59  ;;  %vm1412_vm8 = vmor %vm1410_vm7, %vm1411_vm2  ;;  %v3237_v59 = vld [vmem:[#allocation16_spill] sm:$0xff] }
 0x454   :  { %v1379_v13 = vsel %vm1376_vm0, %v1378_v5, %v1374_v21  ;;  %v1393_v52 = vsel %vm1392_vm14, %v2183_v54, %v1389_v49  ;;  %v1407_v24 = vsub.f32 1.0, %v1406_v40  ;;  %v3238_v5 = vsel %vm2894_vm6, %v3236_v9, %v3237_v59 }
 0x455   :  { %v1398_v29 = vsel %vm1395_vm3, %v1397_v26, %v1393_v52  ;;  %v1421_v60 = vmul.f32 %v2187_v46, %v1379_v13 }
 0x456   :  { %v1420_v20 = vmul.f32 %v1398_v29, %v3032_v36  ;;  %v1408_v39 = vmul.f32 %v2185_v27, %v1407_v24  ;;  %v3066_v36 = vld [vmem:[%s3172_s9] ss:$0 sm:$0xff] }
 0x458   :  { %v3060_v47 = vadd.f32 %v1421_v60, %v1420_v20  ;;  %v1409_v50 = vadd.f32 %v2185_v27, %v1408_v39 }
 0x45a   :  { %2188 = vtanh.f32 %v3060_v47  ;;  %v1413_v22 = vsel %vm1412_vm8, %v2185_v27, %v1409_v50  ;;  %vm1582_vm8 = vcmask 1024  }
 0x45b   :  { %v1418_v8 = vsel %vm1415_vm9, %v1417_v7, %v1413_v22 }
 0x460   :  { %v2189_v16 = vpop.eup %2188 }
 0x461   :  { %v1424_v23 = vmul.f32 %v2189_v16, %v1418_v8 }
 0x463   :  { %v1429_v25 = vpack.c.bf16 %v1424_v23, %v1424_v23  ;;  %v3070_v28 = vsel %vm448_vm15, %v1424_v23, %v3035_v6  ;;  %v3074_v30 = vsel %vm448_vm15, %v3035_v6, %v1424_v23  ;;  %v3227_v6 = vld [vmem:[#allocation11_spill] sm:$0xff] }
 0x464   :  { %v1559_v34 = vmul.f32 %v3066_v36, %v3070_v28  ;;  %v1558_v35 = vmul.f32 %v3066_v36, %v3074_v30  ;;  %v3229_v15 = vsel %vm2818_vm4, %v3227_v6, %v3228_v33 }
 0x465   :  { %1438 = vmatmul.bf16.vlgmr.msra.gmra.mxu0 %v1429_v25  ;;  %1451 = vmatmul.bf16.vlgmr.msra.gmra.mxu1 %v1429_v25 }
 0x466   :  { %1464 = vmatmul.bf16.vlgmr.msrb.gmra.mxu2 %v1429_v25  ;;  %1477 = vmatmul.bf16.vlgmr.msrb.gmra.mxu3 %v1429_v25  ;;  %v1568_v37 = vsel %vm1561_vm10, %v1559_v34, 0.0  ;;  %v1565_v45 = vsel %vm1561_vm10, %v1558_v35, 0.0 }
 0x467   :  { %1569 = vadd.xlane.f32.xlu2 %v1568_v37  ;;  %1566 = vadd.xlane.f32.xlu1 %v1565_v45 }
 0x4da   :  { %v1570_v38 = vpop.xlane.xlu2 %1569 }
 0x4e2   :  { %v1439_v43 = vpop.f32.mrf.mxu0  ;;  %v1452_v31 = vpop.f32.mrf.mxu1 }
 0x4e3   :  { %v1482_v56 = vadd.f32 %v1439_v43, %v3229_v15  ;;  %v1483_v17 = vadd.f32 %v1452_v31, %v3232_v11 }
 0x4e5   :  { %v1994_v4 = vmul.f32 -1.442695, %v1482_v56  ;;  %v1995_v32 = vmul.f32 -1.442695, %v1483_v17 }
 0x4e7   :  { %2190 = vpow2.f32 %v1994_v4 }
 0x4e8   :  { %2192 = vpow2.f32 %v1995_v32 }
 0x4e9   :  { %v1465_v14 = vpop.f32.mrf.mxu2  ;;  %v1478_v12 = vpop.f32.mrf.mxu3 }
 0x4ea   :  { %v1485_v54 = vadd.f32 %v1478_v12, %v3235_v10  ;;  %v1441_v42 = vpop.f32.mrf.mxu0  ;;  %v1454_v2 = vpop.f32.mrf.mxu1  ;;  %v1484_v49 = vadd.f32 %v1465_v14, %v3238_v5  ;;  %v2140_v10 = vld [vmem:[#allocation2] ss:$0 sm:$0xff] }
 0x4eb   :  { %v1580_v42 = vadd.f32 %v2140_v10, %v1570_v38 }
 0x4ec   :  { %v1996_v55 = vmul.f32 -1.442695, %v1485_v54  ;;  %v1567_v54 = vpop.xlane.xlu1 %1566 }
 0x4ed   :  { %v2191_v63 = vpop.eup %2190  ;;  %v1579_v2 = vadd.f32 %v2140_v10, %v1567_v54 }
 0x4ee   :  { %v2193_v41 = vpop.eup %2192  ;;  %v1489_v51 = vadd.f32 1.0, %v2191_v63  ;;  %2194 = vpow2.f32 %v1996_v55 }
 0x4ef   :  { %v1508_v61 = vadd.f32 1.0, %v2193_v41 }
 0x4f0   :  { %2196 = vrcp.f32 %v1489_v51  ;;  %v1501_v52 = vand.u32 2147483648, %v1489_v51  ;;  %v1499_v60 = vand.u32 2147483647, %v1489_v51  ;;  %vm1495_vm1 = vweird.f32 %v1489_v51 }
 0x4f1   :  { %2198 = vrcp.f32 %v1508_v61  ;;  %v1467_v53 = vpop.f32.mrf.mxu2  ;;  %v1480_v48 = vpop.f32.mrf.mxu3  ;;  %v1520_v24 = vand.u32 2147483648, %v1508_v61  ;;  %v1518_v39 = vand.u32 2147483647, %v1508_v61  ;;  %vm1514_vm6 = vweird.f32 %v1508_v61 }
 0x4f2   :  { %v1502_v62 = vor.u32 1.1754944e-38, %v1501_v52  ;;  %vm1500_vm13 = vcmp.eq.f32.partialorder %v1499_v60, 8.507059e+37 }
 0x4f3   :  { %v1521_v7 = vor.u32 1.1754944e-38, %v1520_v24  ;;  %vm1519_vm14 = vcmp.eq.f32.partialorder %v1518_v39, 8.507059e+37 }
 0x4f4   :  { %v2195_v18 = vpop.eup %2194 }
 0x4f5   :  { %v1528_v19 = vadd.f32 1.0, %v2195_v18 }
 0x4f6   :  { %v2197_v27 = vpop.eup %2196 }
 0x4f7   :  { %v2199_v40 = vpop.eup %2198  ;;  %v1491_v26 = vmul.f32 %v2197_v27, %v1489_v51  ;;  %2200 = vrcp.f32 %v1528_v19  ;;  %vm1496_vm4 = vweird.f32 %v2197_v27  ;;  %v1540_v33 = vand.u32 2147483648, %v1528_v19 }
 0x4f8   :  { %v1510_v21 = vmul.f32 %v2199_v40, %v1508_v61  ;;  %2202 = vtanh.f32 %v1484_v49  ;;  %vm1515_vm5 = vweird.f32 %v2199_v40  ;;  %vm1497_vm11 = vmor %vm1495_vm1, %vm1496_vm4  ;;  %vm1534_vm3 = vweird.f32 %v1528_v19 }
 0x4f9   :  { %v1492_v46 = vsub.f32 1.0, %v1491_v26  ;;  %vm1516_vm12 = vmor %vm1514_vm6, %vm1515_vm5  ;;  %v1538_v15 = vand.u32 2147483647, %v1528_v19  ;;  %v1541_v57 = vor.u32 1.1754944e-38, %v1540_v33  ;;  %v1585_v51 = vsel %vm1582_vm8, %v1580_v42, -inf }
 0x4fa   :  { %v1511_v13 = vsub.f32 1.0, %v1510_v21 }
 0x4fb   :  { %v1493_v29 = vmul.f32 %v2197_v27, %v1492_v46  ;;  %vm1539_vm7 = vcmp.eq.f32.partialorder %v1538_v15, 8.507059e+37 }
 0x4fc   :  { %v1512_v20 = vmul.f32 %v2199_v40, %v1511_v13 }
 0x4fd   :  { %v2201_v44 = vpop.eup %2200  ;;  %v1494_v50 = vadd.f32 %v2197_v27, %v1493_v29 }
 0x4fe   :  { %v1513_v0 = vadd.f32 %v2199_v40, %v1512_v20  ;;  %v1530_v22 = vmul.f32 %v2201_v44, %v1528_v19  ;;  %v2203_v8 = vpop.eup %2202  ;;  %vm1535_vm0 = vweird.f32 %v2201_v44 }
 0x4ff   :  { %v1498_v16 = vsel %vm1497_vm11, %v2197_v27, %v1494_v50  ;;  %vm1536_vm2 = vmor %vm1534_vm3, %vm1535_vm0 }
 0x500   :  { %v1503_v23 = vsel %vm1500_vm13, %v1502_v62, %v1498_v16  ;;  %v1517_v25 = vsel %vm1516_vm12, %v2199_v40, %v1513_v0  ;;  %v1531_v34 = vsub.f32 1.0, %v1530_v22 }
 0x501   :  { %v1522_v35 = vsel %vm1519_vm14, %v1521_v7, %v1517_v25  ;;  %v1545_v37 = vmul.f32 %v2203_v8, %v1503_v23  ;;  %v2094_v23 = vld [vmem:[%s3174_s11 + $0x38] sm:$0xff]  ;;  %v2093_v25 = vld [vmem:[%s3174_s11 + $0x30] sm:$0xff] }
 0x502   :  { %v1544_v45 = vmul.f32 %v1522_v35, %v3060_v47  ;;  %v1532_v43 = vmul.f32 %v2201_v44, %v1531_v34  ;;  %1714 = vmatpush.bf16.msrb.mxu0 %v2094_v23  ;;  %v2092_v34 = vld [vmem:[%s3174_s11 + $0x28] sm:$0xff]  ;;  %v2091_v35 = vld [vmem:[%s3174_s11 + $0x20] sm:$0xff] }
 0x504   :  { %v1546_v31 = vadd.f32 %v1545_v37, %v1544_v45  ;;  %v1533_v6 = vadd.f32 %v2201_v44, %v1532_v43  ;;  %v2090_v37 = vld [vmem:[%s3174_s11 + $0x18] sm:$0xff]  ;;  %v2089_v45 = vld [vmem:[%s3174_s11 + $0x10] sm:$0xff]  ;;  %v2088_v43 = vld [vmem:[%s3174_s11 + $0x8] sm:$0xff] }
 0x506   :  { %2204 = vtanh.f32 %v1546_v31  ;;  %v1537_v56 = vsel %vm1536_vm2, %v2201_v44, %v1533_v6  ;;  %1715 = vmatpush.bf16.msrb.mxu0 %v2093_v25  ;;  %v2087_v31 = vld [vmem:[%s3174_s11] sm:$0xff] }
 0x507   :  { %v1542_v11 = vsel %vm1539_vm7, %v1541_v57, %v1537_v56 }
 0x50a   :  { %1716 = vmatpush.bf16.msrb.mxu0 %v2092_v34 }
 0x50c   :  { %v2205_v3 = vpop.eup %2204 }
 0x50d   :  { %v1548_v17 = vmul.f32 %v2205_v3, %v1542_v11 }
 0x50e   :  { %1717 = vmatpush.bf16.msrb.mxu0 %v2091_v35 }
 0x50f   :  { %v3105_v4 = vsel %vm448_vm15, %v1548_v17, %v2975_v58  ;;  %v3109_v47 = vsel %vm448_vm15, %v2975_v58, %v1548_v17  ;;  %vm1727_vm15 = vcmask 25600  }
 0x510   :  { %v1560_v32 = vmul.f32 %v3066_v36, %v3105_v4  ;;  %v1557_v14 = vmul.f32 %v3066_v36, %v3109_v47  ;;  %v1584_v36 = vsel %vm1582_vm8, %v1579_v2, -inf }
 0x512   :  { %v1571_v12 = vsel %vm1561_vm10, %v1560_v32, 0.0  ;;  %v1562_v1 = vsel %vm1561_vm10, %v1557_v14, 0.0  ;;  %1718 = vmatpush.bf16.msrb.mxu0 %v2090_v37 }
 0x513   :  { %1572 = vadd.xlane.f32.xlu2 %v1571_v12  ;;  %1563 = vadd.xlane.f32.xlu0 %v1562_v1 }
 0x516   :  { %1719 = vmatpush.bf16.msrb.mxu0 %v2089_v45 }
 0x51a   :  { %1720 = vmatpush.bf16.msrb.mxu0 %v2088_v43 }
 0x51e   :  { %1721 = vmatpush.bf16.msrb.mxu0 %v2087_v31 }
 0x586   :  { %v1573_v58 = vpop.xlane.xlu2 %1572  ;;  %v1564_v55 = vpop.xlane.xlu0 %1563 }
 0x587   :  { %v1581_v63 = vadd.f32 %v2140_v10, %v1573_v58  ;;  %v1578_v41 = vadd.f32 %v2140_v10, %v1564_v55 }
 0x589   :  { %v1586_v61 = vsel %vm1582_vm8, %v1581_v63, -inf  ;;  %v1583_v53 = vsel %vm1582_vm8, %v1578_v41, -inf }
 0x58a   :  { %v1588_v48 = vmax.f32 %v1585_v51, %v1586_v61  ;;  %v1587_v18 = vmax.f32 %v1583_v53, %v1584_v36 }
 0x58c   :  { %v1589_v19 = vmax.f32 %v1587_v18, %v1588_v48 }
 0x58e   :  { %v1590_v27 = vsub.f32 %v1578_v41, %v1589_v19  ;;  %v1591_v9 = vsub.f32 %v1579_v2, %v1589_v19  ;;  %v1593_v59 = vsub.f32 %v1581_v63, %v1589_v19  ;;  %v1592_v5 = vsub.f32 %v1580_v42, %v1589_v19 }
 0x590   :  { %v1594_v49 = vmul.f32 1.442695, %v1590_v27  ;;  %v1596_v40 = vmul.f32 1.442695, %v1591_v9  ;;  %v1600_v26 = vmul.f32 1.442695, %v1593_v59 }
 0x591   :  { %v1598_v21 = vmul.f32 1.442695, %v1592_v5 }
 0x592   :  { %2206 = vpow2.f32 %v1594_v49 }
 0x593   :  { %2208 = vpow2.f32 %v1596_v40 }
 0x594   :  { %2210 = vpow2.f32 %v1600_v26 }
 0x595   :  { %2212 = vpow2.f32 %v1598_v21 }
 0x598   :  { %v2207_v46 = vpop.eup %2206 }
 0x599   :  { %v2209_v13 = vpop.eup %2208  ;;  %v1602_v52 = vsel %vm1582_vm8, %v2207_v46, 0.0 }
 0x59a   :  { %v2211_v24 = vpop.eup %2210  ;;  %v1603_v29 = vsel %vm1582_vm8, %v2209_v13, 0.0 }
 0x59b   :  { %v2213_v60 = vpop.eup %2212  ;;  %v1604_v20 = vadd.f32 %v1603_v29, %v1602_v52  ;;  %v1607_v50 = vsel %vm1582_vm8, %v2211_v24, 0.0 }
 0x59c   :  { %v1605_v39 = vsel %vm1582_vm8, %v2213_v60, 0.0 }
 0x59d   :  { %v1606_v44 = vadd.f32 %v1605_v39, %v1604_v20 }
 0x59f   :  { %v1608_v62 = vadd.f32 %v1607_v50, %v1606_v44 }
 0x5a1   :  { %2214 = vrcp.f32 %v1608_v62 }
 0x5a7   :  { %v2215_v0 = vpop.eup %2214 }
 0x5a8   :  { %v1612_v22 = vmul.f32 %v2215_v0, %v2213_v60  ;;  %v1611_v7 = vmul.f32 %v2215_v0, %v2209_v13  ;;  %v1610_v16 = vmul.f32 %v2215_v0, %v2207_v46  ;;  %v1613_v8 = vmul.f32 %v2215_v0, %v2211_v24 }
 0x5aa   :  { %1626 = vperm.xlu2 %2136, %v1612_v22   ;;  %1621 = vperm.xlu1 %2135, %v1611_v7  }
 0x5ab   :  { %1616 = vperm.xlu0 %2134, %v1610_v16  }
 0x5b2   :  { %1631 = vperm.xlu1 %2135, %v1613_v8  }
 0x604   :  { %v1627_v56 = vpop.permute.xlu2 %1626 }
 0x605   :  { %v1636_v17 = vmul.f32 %v1627_v56, %v3070_v28 }
 0x607   :  { %v1641_v12 = vsel %vm1561_vm10, %v1636_v17, 0.0 }
 0x61c   :  { %v1622_v6 = vpop.permute.xlu1 %1621 }
 0x61d   :  { %v1635_v33 = vmul.f32 %v1622_v6, %v3074_v30  ;;  %v1617_v15 = vpop.permute.xlu0 %1616 }
 0x61e   :  { %v1634_v57 = vmul.f32 %v1617_v15, %v3109_v47  ;;  %v2141_v47 = vld [vmem:[%s3175_s12] ss:$0 sm:$0xff] }
 0x61f   :  { %v1639_v3 = vsel %vm1561_vm10, %v1635_v33, 0.0 }
 0x620   :  { %v1638_v11 = vsel %vm1561_vm10, %v1634_v57, 0.0 }
 0x621   :  { %v1640_v32 = vadd.f32 %v1639_v3, %v1638_v11 }
 0x623   :  { %v1642_v38 = vadd.f32 %v1641_v12, %v1640_v32 }
 0x624   :  { %v1632_v14 = vpop.permute.xlu1 %1631 }
 0x625   :  { %v1637_v1 = vmul.f32 %v1632_v14, %v3105_v4 }
 0x627   :  { %v1643_v10 = vsel %vm1561_vm10, %v1637_v1, 0.0 }
 0x628   :  { %v1644_v30 = vadd.f32 %v1643_v10, %v1642_v38 }
 0x62a   :  { %v1645_v54 = vpack.c.bf16 %v1644_v30, %v1644_v30 }
 0x62c   :  { %1722 = vmatmul.bf16.vlgmr.msrb.gmra.mxu0 %v1645_v54 }
 0x6a9   :  { %v1723_v28 = vpop.f32.mrf.mxu0 }
 0x6aa   :  { %v1724_v42 = vadd.f32 %v2141_v47, %v1723_v28 }
 0x6ac   :  { %1728 = vst.msk [vmem:[#allocation6] sm:$0x3] %vm1727_vm15, %v1724_v42 }
 0x6ad   :  { %1739 = dma.vmem_to_hbm [thread:$0]  %s1735_s20, 32, %s1737_s22, [#allocation5]  }
 0x6b1   :  { %v1725_v4 = vpop.f32.mrf.mxu0 }
 0x6b2   :  { %2266 = dma.done.wait [#allocation5], 32  }
 0x6b3   :  { %2267 = vsyncadd [#allocation5], 4294967264 }
 0x6b4   :  { %1744 = vsyncpa [#allocation4], 1 }
 0x6b5   :  { %1745 = vsyncpa [#allocation5], 1 }

</bundles_post_ra>
